<compile_context>
chip_gen: v6e
topology: v6e:2x2x1
jax: 0.10.0
libtpu: 0.0.40
codegen_flags: <defaults>
</compile_context>

<pallas_src>
import jax
import jax.numpy as jnp
import numpy as np
from jax.experimental import pallas as pl
from jax.experimental.pallas import tpu as pltpu

H = W = 16                   # demo spatial size (matches the example input)
HW = H * W                   # 256 lanes -> lane-dense (multiple of 128)
PAD = 128                    # zero pad (in lanes) on each side of the canvas
CANVAS = PAD + HW + PAD      # 512
K = 3                        # conv kernel size
CMAX = 8                     # all channel dims padded to 8 (one f32 sublane tile)

assert HW % 128 == 0 and PAD >= (K - 1) * (W + 1)
assert W & (W - 1) == 0      # validity mask uses shift/and tricks
_LOG2W = W.bit_length() - 1

# Flat-canvas tap offsets.
#  Conv2d (cross-correlation):   out(y,x) += w[ky,kx] * in(y+ky, x+kx)
#  ConvTranspose2d:              out(y,x) += w[ay,ax] * in(y-ay, x-ax)
_CONV_SHIFTS = tuple(ky * W + kx for ky in range(K) for kx in range(K))
_CONVT_SHIFTS = tuple(-(ay * W + ax) for ay in range(K) for ax in range(K))


# ------------------------------ Pallas kernel ------------------------------ #
def _edge2d_kernel(x_ref, w1_ref, b1_ref, w2_ref, b2_ref, w3_ref, b3_ref,
                   w4_ref, b4_ref, o_ref, canvas_ref):
    # Flat-spatial row / column indices: built once, reused by every layer mask.
    flat = jax.lax.broadcasted_iota(jnp.int32, (1, HW), 1)
    row = flat >> _LOG2W
    col = flat & (W - 1)

    # Re-init canvas for this batch element: zero side pads, place input.
    # (Scratch is not guaranteed clean per grid step / per core, so always init.)
    canvas_ref[:, 0:PAD] = jnp.zeros((CMAX, PAD), jnp.float32)
    canvas_ref[:, PAD + HW:CANVAS] = jnp.zeros((CMAX, PAD), jnp.float32)
    canvas_ref[:, PAD:PAD + HW] = x_ref[0]                 # (8, 256)

    def layer(w_ref, b_ref, shifts, valid):
        """One (transposed) conv layer: 9 shifted (8,8)@(8,256) MXU GEMMs."""
        acc = jnp.zeros((CMAX, HW), jnp.float32)
        for t, s in enumerate(shifts):
            act = canvas_ref[:, PAD + s:PAD + s + HW]      # (8, 256) static slice
            acc = acc + jnp.dot(w_ref[t], act,             # (8,8) @ (8,256)
                                preferred_element_type=jnp.float32)
        acc = jnp.maximum(acc + b_ref[...], 0.0)           # bias (8,1) bcast + ReLU
        vh, vw = valid
        if vh < H or vw < W:                               # zero outside valid box
            ok = (row < vh) & (col < vw)
            acc = jnp.where(ok, acc, 0.0)
        return acc

    # encoder
    h = layer(w1_ref, b1_ref, _CONV_SHIFTS, (H - 2, W - 2))
    canvas_ref[:, PAD:PAD + HW] = h
    h = layer(w2_ref, b2_ref, _CONV_SHIFTS, (H - 4, W - 4))
    canvas_ref[:, PAD:PAD + HW] = h
    # decoder
    h = layer(w3_ref, b3_ref, _CONVT_SHIFTS, (H - 2, W - 2))
    canvas_ref[:, PAD:PAD + HW] = h
    h = layer(w4_ref, b4_ref, _CONVT_SHIFTS, (H, W))
    o_ref[0] = h[0:1, :]                                   # lane-dense (1, 256)


# ------------------------------ host wrappers ------------------------------ #
def _pack_conv(w):
    # Conv2d weight (Co,Ci,K,K) -> (K*K, 8, 8) with wp[ky*K+kx, co, ci] = w[co,ci,ky,kx]
    co, ci = w.shape[0], w.shape[1]
    wp = jnp.transpose(w, (2, 3, 0, 1)).reshape(K * K, co, ci)
    return jnp.pad(wp, ((0, 0), (0, CMAX - co), (0, CMAX - ci)))


def _pack_convt(w):
    # ConvTranspose2d weight (Ci,Co,K,K) -> (K*K, 8, 8) with wp[ay*K+ax, co, ci] = w[ci,co,ay,ax]
    ci, co = w.shape[0], w.shape[1]
    wp = jnp.transpose(w, (2, 3, 1, 0)).reshape(K * K, co, ci)
    return jnp.pad(wp, ((0, 0), (0, CMAX - co), (0, CMAX - ci)))


def _pack_bias(b):
    return jnp.pad(b.reshape(-1, 1), ((0, CMAX - b.shape[0]), (0, 0)))


@jax.jit
def net_forward(x_nchw, p):
    N, Ci, Hi, Wi = x_nchw.shape
    assert (Ci, Hi, Wi) == (3, H, W)
    # NCHW flattened is already channels-on-sublanes / flat-spatial-on-lanes.
    x = jnp.pad(x_nchw.reshape(N, Ci, HW), ((0, 0), (0, CMAX - Ci), (0, 0)))
    args = (x,
            _pack_conv(p['w1']), _pack_bias(p['b1']),
            _pack_conv(p['w2']), _pack_bias(p['b2']),
            _pack_convt(p['w3']), _pack_bias(p['b3']),
            _pack_convt(p['w4']), _pack_bias(p['b4']))

    wspec = pl.BlockSpec((K * K, CMAX, CMAX), lambda b: (0, 0, 0))  # resident
    bspec = pl.BlockSpec((CMAX, 1), lambda b: (0, 0))               # resident
    out = pl.pallas_call(
        _edge2d_kernel,
        out_shape=jax.ShapeDtypeStruct((N, 1, HW), jnp.float32),
        grid_spec=pltpu.PrefetchScalarGridSpec(
            num_scalar_prefetch=0,
            grid=(N,),
            in_specs=[pl.BlockSpec((1, CMAX, HW), lambda b: (b, 0, 0)),
                      wspec, bspec, wspec, bspec, wspec, bspec, wspec, bspec],
            out_specs=pl.BlockSpec((1, 1, HW), lambda b: (b, 0, 0)),
            scratch_shapes=[pltpu.VMEM((CMAX, CANVAS), jnp.float32)]),
        compiler_params=pltpu.CompilerParams(
            dimension_semantics=("parallel",)),
    )(*args)
    return out.reshape(N, 1, H, W)


def init_params(key):
    """Deterministic uniform(-1/sqrt(fan_in), +) init, PyTorch-style shapes."""
    def u(k, shape, fan_in):
        bound = 1.0 / np.sqrt(fan_in)
        return jax.random.uniform(k, shape, jnp.float32, -bound, bound)
    ks = jax.random.split(key, 8)
    return {
        'w1': u(ks[0], (5, 3, 3, 3), 3 * 9), 'b1': u(ks[1], (5,), 3 * 9),
        'w2': u(ks[2], (8, 5, 3, 3), 5 * 9), 'b2': u(ks[3], (8,), 5 * 9),
        'w3': u(ks[4], (8, 5, 3, 3), 8 * 9), 'b3': u(ks[5], (5,), 8 * 9),
        'w4': u(ks[6], (5, 1, 3, 3), 5 * 9), 'b4': u(ks[7], (1,), 5 * 9),
    }


# -------------------------- numpy reference check -------------------------- #
def _np_conv2d(x, w, b):
    N, Ci, Hh, Ww = x.shape
    Co, _, Kk, _ = w.shape
    Ho, Wo = Hh - Kk + 1, Ww - Kk + 1
    out = np.zeros((N, Co, Ho, Wo), np.float32)
    for oy in range(Ho):
        for ox in range(Wo):
            out[:, :, oy, ox] = np.einsum('ncij,ocij->no',
                                          x[:, :, oy:oy + Kk, ox:ox + Kk], w)
    return out + b[None, :, None, None]


def _np_conv_transpose2d(x, w, b):
    N, Ci, Hh, Ww = x.shape
    _, Co, Kk, _ = w.shape
    out = np.zeros((N, Co, Hh + Kk - 1, Ww + Kk - 1), np.float32)
    for iy in range(Hh):
        for ix in range(Ww):
            out[:, :, iy:iy + Kk, ix:ix + Kk] += np.einsum(
                'nc,coij->noij', x[:, :, iy, ix], w)
    return out + b[None, :, None, None]


def _ref_forward(x, p):
    r = lambda t: np.maximum(t, 0.0)
    x = r(_np_conv2d(x, p['w1'], p['b1']))
    x = r(_np_conv2d(x, p['w2'], p['b2']))
    x = r(_np_conv_transpose2d(x, p['w3'], p['b3']))
    x = r(_np_conv_transpose2d(x, p['w4'], p['b4']))
    return x


if __name__ == "__main__":
    key = jax.random.PRNGKey(0)
    k_x, k_p = jax.random.split(key)
    params = init_params(k_p)
    x = jax.random.normal(k_x, (2, 3, 16, 16), jnp.float32)   # NCHW, like PyTorch

    out = jax.block_until_ready(net_forward(x, params))
    assert out.shape == (2, 1, 16, 16), out.shape

    ref = _ref_forward(np.asarray(x), {k: np.asarray(v) for k, v in params.items()})
    # Tolerance accommodates the MXU's default (bf16-pass) f32 matmul precision.
    np.testing.assert_allclose(np.asarray(out), ref, rtol=2e-2, atol=2e-2)
    print("KERNEL_OK")
</pallas_src>

<mosaic_0001>
module attributes {stable_mosaic.version = 11 : i64} {
  func.func @_edge2d_kernel(%arg0: i32, %arg1: memref<1x8x256xf32, #tpu.memory_space<vmem>>, %arg2: memref<9x8x8xf32, #tpu.memory_space<vmem>>, %arg3: memref<8x1xf32, #tpu.memory_space<vmem>>, %arg4: memref<9x8x8xf32, #tpu.memory_space<vmem>>, %arg5: memref<8x1xf32, #tpu.memory_space<vmem>>, %arg6: memref<9x8x8xf32, #tpu.memory_space<vmem>>, %arg7: memref<8x1xf32, #tpu.memory_space<vmem>>, %arg8: memref<9x8x8xf32, #tpu.memory_space<vmem>>, %arg9: memref<8x1xf32, #tpu.memory_space<vmem>>, %arg10: memref<1x1x256xf32, #tpu.memory_space<vmem>>, %arg11: memref<8x512xf32, #tpu.memory_space<vmem>>) attributes {dimension_semantics = [#tpu.dimension_semantics<parallel>], iteration_bounds = array<i64: 2>, scalar_prefetch = 0 : i64, scratch_operands = 1 : i64, tpu.core_type = #tpu.core_type<tc>, window_params = [{transform_indices = @transform_0, window_bounds = array<i64: 1, 8, 256>}, {pipeline_mode = #tpu.pipeline_mode<synchronous>, transform_indices = @transform_1, window_bounds = array<i64: 9, 8, 8>}, {pipeline_mode = #tpu.pipeline_mode<synchronous>, transform_indices = @transform_2, window_bounds = array<i64: 8, 1>}, {pipeline_mode = #tpu.pipeline_mode<synchronous>, transform_indices = @transform_3, window_bounds = array<i64: 9, 8, 8>}, {pipeline_mode = #tpu.pipeline_mode<synchronous>, transform_indices = @transform_4, window_bounds = array<i64: 8, 1>}, {pipeline_mode = #tpu.pipeline_mode<synchronous>, transform_indices = @transform_5, window_bounds = array<i64: 9, 8, 8>}, {pipeline_mode = #tpu.pipeline_mode<synchronous>, transform_indices = @transform_6, window_bounds = array<i64: 8, 1>}, {pipeline_mode = #tpu.pipeline_mode<synchronous>, transform_indices = @transform_7, window_bounds = array<i64: 9, 8, 8>}, {pipeline_mode = #tpu.pipeline_mode<synchronous>, transform_indices = @transform_8, window_bounds = array<i64: 8, 1>}, {transform_indices = @transform_9, window_bounds = array<i64: 1, 1, 256>}]} {
    %0 = tpu.iota {dimensions = array<i32: 1>} : vector<1x256xi32>
    %c4_i32 = arith.constant 4 : i32
    %1 = vector.broadcast %c4_i32 : i32 to vector<1x256xi32>
    %2 = arith.shrsi %0, %1 : vector<1x256xi32>
    %c15_i32 = arith.constant 15 : i32
    %3 = vector.broadcast %c15_i32 : i32 to vector<1x256xi32>
    %4 = arith.andi %0, %3 : vector<1x256xi32>
    %cst = arith.constant 0.000000e+00 : f32
    %5 = vector.broadcast %cst : f32 to vector<8x128xf32>
    %c0 = arith.constant 0 : index
    %c0_0 = arith.constant 0 : index
    %6 = vector.load %arg11[%c0, %c0_0] : memref<8x512xf32, #tpu.memory_space<vmem>>, vector<8x128xf32>
    tpu.vector_store %arg11[%c0, %c0_0], %5 {strides = array<i32>} : memref<8x512xf32, #tpu.memory_space<vmem>>, vector<8x128xf32>,
    %cst_1 = arith.constant 0.000000e+00 : f32
    %7 = vector.broadcast %cst_1 : f32 to vector<8x128xf32>
    %c0_2 = arith.constant 0 : index
    %c384 = arith.constant 384 : index
    %8 = vector.load %arg11[%c0_2, %c384] : memref<8x512xf32, #tpu.memory_space<vmem>>, vector<8x128xf32>
    tpu.vector_store %arg11[%c0_2, %c384], %7 {strides = array<i32>} : memref<8x512xf32, #tpu.memory_space<vmem>>, vector<8x128xf32>,
    %c0_3 = arith.constant 0 : index
    %c0_4 = arith.constant 0 : index
    %c0_5 = arith.constant 0 : index
    %9 = vector.load %arg1[%c0_3, %c0_4, %c0_5] : memref<1x8x256xf32, #tpu.memory_space<vmem>>, vector<1x8x256xf32>
    %10 = vector.shape_cast %9 : vector<1x8x256xf32> to vector<8x256xf32>
    %c0_6 = arith.constant 0 : index
    %c128 = arith.constant 128 : index
    %11 = vector.load %arg11[%c0_6, %c128] : memref<8x512xf32, #tpu.memory_space<vmem>>, vector<8x256xf32>
    tpu.vector_store %arg11[%c0_6, %c128], %10 {strides = array<i32>} : memref<8x512xf32, #tpu.memory_space<vmem>>, vector<8x256xf32>,
    %cst_7 = arith.constant 0.000000e+00 : f32
    %12 = vector.broadcast %cst_7 : f32 to vector<8x256xf32>
    %c0_8 = arith.constant 0 : index
    %c128_9 = arith.constant 128 : index
    %13 = vector.load %arg11[%c0_8, %c128_9] : memref<8x512xf32, #tpu.memory_space<vmem>>, vector<8x256xf32>
    %c0_10 = arith.constant 0 : index
    %c0_11 = arith.constant 0 : index
    %c0_12 = arith.constant 0 : index
    %14 = vector.load %arg2[%c0_10, %c0_11, %c0_12] : memref<9x8x8xf32, #tpu.memory_space<vmem>>, vector<1x8x8xf32>
    %15 = vector.shape_cast %14 : vector<1x8x8xf32> to vector<8x8xf32>
    %cst_13 = arith.constant dense<0.000000e+00> : vector<8x256xf32>
    %16 = tpu.matmul %15, %13, %cst_13 {dimension_numbers = #tpu.dot_dimension_numbers<[1], [0], [0], [1], [0, 0, 1, 1], [], []>} : vector<8x8xf32>, vector<8x256xf32>, vector<8x256xf32> -> vector<8x256xf32>
    %17 = arith.addf %12, %16 : vector<8x256xf32>
    %c0_14 = arith.constant 0 : index
    %c129 = arith.constant 129 : index
    %18 = vector.load %arg11[%c0_14, %c129] : memref<8x512xf32, #tpu.memory_space<vmem>>, vector<8x256xf32>
    %c1 = arith.constant 1 : index
    %c0_15 = arith.constant 0 : index
    %c0_16 = arith.constant 0 : index
    %19 = vector.load %arg2[%c1, %c0_15, %c0_16] : memref<9x8x8xf32, #tpu.memory_space<vmem>>, vector<1x8x8xf32>
    %20 = vector.shape_cast %19 : vector<1x8x8xf32> to vector<8x8xf32>
    %cst_17 = arith.constant dense<0.000000e+00> : vector<8x256xf32>
    %21 = tpu.matmul %20, %18, %cst_17 {dimension_numbers = #tpu.dot_dimension_numbers<[1], [0], [0], [1], [0, 0, 1, 1], [], []>} : vector<8x8xf32>, vector<8x256xf32>, vector<8x256xf32> -> vector<8x256xf32>
    %22 = arith.addf %17, %21 : vector<8x256xf32>
    %c0_18 = arith.constant 0 : index
    %c130 = arith.constant 130 : index
    %23 = vector.load %arg11[%c0_18, %c130] : memref<8x512xf32, #tpu.memory_space<vmem>>, vector<8x256xf32>
    %c2 = arith.constant 2 : index
    %c0_19 = arith.constant 0 : index
    %c0_20 = arith.constant 0 : index
    %24 = vector.load %arg2[%c2, %c0_19, %c0_20] : memref<9x8x8xf32, #tpu.memory_space<vmem>>, vector<1x8x8xf32>
    %25 = vector.shape_cast %24 : vector<1x8x8xf32> to vector<8x8xf32>
    %cst_21 = arith.constant dense<0.000000e+00> : vector<8x256xf32>
    %26 = tpu.matmul %25, %23, %cst_21 {dimension_numbers = #tpu.dot_dimension_numbers<[1], [0], [0], [1], [0, 0, 1, 1], [], []>} : vector<8x8xf32>, vector<8x256xf32>, vector<8x256xf32> -> vector<8x256xf32>
    %27 = arith.addf %22, %26 : vector<8x256xf32>
    %c0_22 = arith.constant 0 : index
    %c144 = arith.constant 144 : index
    %28 = vector.load %arg11[%c0_22, %c144] : memref<8x512xf32, #tpu.memory_space<vmem>>, vector<8x256xf32>
    %c3 = arith.constant 3 : index
    %c0_23 = arith.constant 0 : index
    %c0_24 = arith.constant 0 : index
    %29 = vector.load %arg2[%c3, %c0_23, %c0_24] : memref<9x8x8xf32, #tpu.memory_space<vmem>>, vector<1x8x8xf32>
    %30 = vector.shape_cast %29 : vector<1x8x8xf32> to vector<8x8xf32>
    %cst_25 = arith.constant dense<0.000000e+00> : vector<8x256xf32>
    %31 = tpu.matmul %30, %28, %cst_25 {dimension_numbers = #tpu.dot_dimension_numbers<[1], [0], [0], [1], [0, 0, 1, 1], [], []>} : vector<8x8xf32>, vector<8x256xf32>, vector<8x256xf32> -> vector<8x256xf32>
    %32 = arith.addf %27, %31 : vector<8x256xf32>
    %c0_26 = arith.constant 0 : index
    %c145 = arith.constant 145 : index
    %33 = vector.load %arg11[%c0_26, %c145] : memref<8x512xf32, #tpu.memory_space<vmem>>, vector<8x256xf32>
    %c4 = arith.constant 4 : index
    %c0_27 = arith.constant 0 : index
    %c0_28 = arith.constant 0 : index
    %34 = vector.load %arg2[%c4, %c0_27, %c0_28] : memref<9x8x8xf32, #tpu.memory_space<vmem>>, vector<1x8x8xf32>
    %35 = vector.shape_cast %34 : vector<1x8x8xf32> to vector<8x8xf32>
    %cst_29 = arith.constant dense<0.000000e+00> : vector<8x256xf32>
    %36 = tpu.matmul %35, %33, %cst_29 {dimension_numbers = #tpu.dot_dimension_numbers<[1], [0], [0], [1], [0, 0, 1, 1], [], []>} : vector<8x8xf32>, vector<8x256xf32>, vector<8x256xf32> -> vector<8x256xf32>
    %37 = arith.addf %32, %36 : vector<8x256xf32>
    %c0_30 = arith.constant 0 : index
    %c146 = arith.constant 146 : index
    %38 = vector.load %arg11[%c0_30, %c146] : memref<8x512xf32, #tpu.memory_space<vmem>>, vector<8x256xf32>
    %c5 = arith.constant 5 : index
    %c0_31 = arith.constant 0 : index
    %c0_32 = arith.constant 0 : index
    %39 = vector.load %arg2[%c5, %c0_31, %c0_32] : memref<9x8x8xf32, #tpu.memory_space<vmem>>, vector<1x8x8xf32>
    %40 = vector.shape_cast %39 : vector<1x8x8xf32> to vector<8x8xf32>
    %cst_33 = arith.constant dense<0.000000e+00> : vector<8x256xf32>
    %41 = tpu.matmul %40, %38, %cst_33 {dimension_numbers = #tpu.dot_dimension_numbers<[1], [0], [0], [1], [0, 0, 1, 1], [], []>} : vector<8x8xf32>, vector<8x256xf32>, vector<8x256xf32> -> vector<8x256xf32>
    %42 = arith.addf %37, %41 : vector<8x256xf32>
    %c0_34 = arith.constant 0 : index
    %c160 = arith.constant 160 : index
    %43 = vector.load %arg11[%c0_34, %c160] : memref<8x512xf32, #tpu.memory_space<vmem>>, vector<8x256xf32>
    %c6 = arith.constant 6 : index
    %c0_35 = arith.constant 0 : index
    %c0_36 = arith.constant 0 : index
    %44 = vector.load %arg2[%c6, %c0_35, %c0_36] : memref<9x8x8xf32, #tpu.memory_space<vmem>>, vector<1x8x8xf32>
    %45 = vector.shape_cast %44 : vector<1x8x8xf32> to vector<8x8xf32>
    %cst_37 = arith.constant dense<0.000000e+00> : vector<8x256xf32>
    %46 = tpu.matmul %45, %43, %cst_37 {dimension_numbers = #tpu.dot_dimension_numbers<[1], [0], [0], [1], [0, 0, 1, 1], [], []>} : vector<8x8xf32>, vector<8x256xf32>, vector<8x256xf32> -> vector<8x256xf32>
    %47 = arith.addf %42, %46 : vector<8x256xf32>
    %c0_38 = arith.constant 0 : index
    %c161 = arith.constant 161 : index
    %48 = vector.load %arg11[%c0_38, %c161] : memref<8x512xf32, #tpu.memory_space<vmem>>, vector<8x256xf32>
    %c7 = arith.constant 7 : index
    %c0_39 = arith.constant 0 : index
    %c0_40 = arith.constant 0 : index
    %49 = vector.load %arg2[%c7, %c0_39, %c0_40] : memref<9x8x8xf32, #tpu.memory_space<vmem>>, vector<1x8x8xf32>
    %50 = vector.shape_cast %49 : vector<1x8x8xf32> to vector<8x8xf32>
    %cst_41 = arith.constant dense<0.000000e+00> : vector<8x256xf32>
    %51 = tpu.matmul %50, %48, %cst_41 {dimension_numbers = #tpu.dot_dimension_numbers<[1], [0], [0], [1], [0, 0, 1, 1], [], []>} : vector<8x8xf32>, vector<8x256xf32>, vector<8x256xf32> -> vector<8x256xf32>
    %52 = arith.addf %47, %51 : vector<8x256xf32>
    %c0_42 = arith.constant 0 : index
    %c162 = arith.constant 162 : index
    %53 = vector.load %arg11[%c0_42, %c162] : memref<8x512xf32, #tpu.memory_space<vmem>>, vector<8x256xf32>
    %c8 = arith.constant 8 : index
    %c0_43 = arith.constant 0 : index
    %c0_44 = arith.constant 0 : index
    %54 = vector.load %arg2[%c8, %c0_43, %c0_44] : memref<9x8x8xf32, #tpu.memory_space<vmem>>, vector<1x8x8xf32>
    %55 = vector.shape_cast %54 : vector<1x8x8xf32> to vector<8x8xf32>
    %cst_45 = arith.constant dense<0.000000e+00> : vector<8x256xf32>
    %56 = tpu.matmul %55, %53, %cst_45 {dimension_numbers = #tpu.dot_dimension_numbers<[1], [0], [0], [1], [0, 0, 1, 1], [], []>} : vector<8x8xf32>, vector<8x256xf32>, vector<8x256xf32> -> vector<8x256xf32>
    %57 = arith.addf %52, %56 : vector<8x256xf32>
    %c0_46 = arith.constant 0 : index
    %c0_47 = arith.constant 0 : index
    %58 = vector.load %arg3[%c0_46, %c0_47] : memref<8x1xf32, #tpu.memory_space<vmem>>, vector<8x1xf32>
    %59 = vector.broadcast %58 : vector<8x1xf32> to vector<8x256xf32>
    %60 = arith.addf %57, %59 : vector<8x256xf32>
    %cst_48 = arith.constant 0.000000e+00 : f32
    %61 = vector.broadcast %cst_48 : f32 to vector<8x256xf32>
    %62 = arith.maximumf %60, %61 : vector<8x256xf32>
    %c14_i32 = arith.constant 14 : i32
    %63 = vector.broadcast %c14_i32 : i32 to vector<1x256xi32>
    %64 = arith.cmpi slt, %2, %63 : vector<1x256xi32>
    %c14_i32_49 = arith.constant 14 : i32
    %65 = vector.broadcast %c14_i32_49 : i32 to vector<1x256xi32>
    %66 = arith.cmpi slt, %4, %65 : vector<1x256xi32>
    %67 = arith.andi %64, %66 : vector<1x256xi1>
    %cst_50 = arith.constant 0.000000e+00 : f32
    %68 = vector.shape_cast %67 : vector<1x256xi1> to vector<1x256xi1>
    %69 = vector.broadcast %68 : vector<1x256xi1> to vector<8x256xi1>
    %70 = vector.broadcast %cst_50 : f32 to vector<8x256xf32>
    %71 = arith.select %69, %62, %70 : vector<8x256xi1>, vector<8x256xf32>
    %c0_51 = arith.constant 0 : index
    %c128_52 = arith.constant 128 : index
    %72 = vector.load %arg11[%c0_51, %c128_52] : memref<8x512xf32, #tpu.memory_space<vmem>>, vector<8x256xf32>
    tpu.vector_store %arg11[%c0_51, %c128_52], %71 {strides = array<i32>} : memref<8x512xf32, #tpu.memory_space<vmem>>, vector<8x256xf32>,
    %cst_53 = arith.constant 0.000000e+00 : f32
    %73 = vector.broadcast %cst_53 : f32 to vector<8x256xf32>
    %c0_54 = arith.constant 0 : index
    %c128_55 = arith.constant 128 : index
    %74 = vector.load %arg11[%c0_54, %c128_55] : memref<8x512xf32, #tpu.memory_space<vmem>>, vector<8x256xf32>
    %c0_56 = arith.constant 0 : index
    %c0_57 = arith.constant 0 : index
    %c0_58 = arith.constant 0 : index
    %75 = vector.load %arg4[%c0_56, %c0_57, %c0_58] : memref<9x8x8xf32, #tpu.memory_space<vmem>>, vector<1x8x8xf32>
    %76 = vector.shape_cast %75 : vector<1x8x8xf32> to vector<8x8xf32>
    %cst_59 = arith.constant dense<0.000000e+00> : vector<8x256xf32>
    %77 = tpu.matmul %76, %74, %cst_59 {dimension_numbers = #tpu.dot_dimension_numbers<[1], [0], [0], [1], [0, 0, 1, 1], [], []>} : vector<8x8xf32>, vector<8x256xf32>, vector<8x256xf32> -> vector<8x256xf32>
    %78 = arith.addf %73, %77 : vector<8x256xf32>
    %c0_60 = arith.constant 0 : index
    %c129_61 = arith.constant 129 : index
    %79 = vector.load %arg11[%c0_60, %c129_61] : memref<8x512xf32, #tpu.memory_space<vmem>>, vector<8x256xf32>
    %c1_62 = arith.constant 1 : index
    %c0_63 = arith.constant 0 : index
    %c0_64 = arith.constant 0 : index
    %80 = vector.load %arg4[%c1_62, %c0_63, %c0_64] : memref<9x8x8xf32, #tpu.memory_space<vmem>>, vector<1x8x8xf32>
    %81 = vector.shape_cast %80 : vector<1x8x8xf32> to vector<8x8xf32>
    %cst_65 = arith.constant dense<0.000000e+00> : vector<8x256xf32>
    %82 = tpu.matmul %81, %79, %cst_65 {dimension_numbers = #tpu.dot_dimension_numbers<[1], [0], [0], [1], [0, 0, 1, 1], [], []>} : vector<8x8xf32>, vector<8x256xf32>, vector<8x256xf32> -> vector<8x256xf32>
    %83 = arith.addf %78, %82 : vector<8x256xf32>
    %c0_66 = arith.constant 0 : index
    %c130_67 = arith.constant 130 : index
    %84 = vector.load %arg11[%c0_66, %c130_67] : memref<8x512xf32, #tpu.memory_space<vmem>>, vector<8x256xf32>
    %c2_68 = arith.constant 2 : index
    %c0_69 = arith.constant 0 : index
    %c0_70 = arith.constant 0 : index
    %85 = vector.load %arg4[%c2_68, %c0_69, %c0_70] : memref<9x8x8xf32, #tpu.memory_space<vmem>>, vector<1x8x8xf32>
    %86 = vector.shape_cast %85 : vector<1x8x8xf32> to vector<8x8xf32>
    %cst_71 = arith.constant dense<0.000000e+00> : vector<8x256xf32>
    %87 = tpu.matmul %86, %84, %cst_71 {dimension_numbers = #tpu.dot_dimension_numbers<[1], [0], [0], [1], [0, 0, 1, 1], [], []>} : vector<8x8xf32>, vector<8x256xf32>, vector<8x256xf32> -> vector<8x256xf32>
    %88 = arith.addf %83, %87 : vector<8x256xf32>
    %c0_72 = arith.constant 0 : index
    %c144_73 = arith.constant 144 : index
    %89 = vector.load %arg11[%c0_72, %c144_73] : memref<8x512xf32, #tpu.memory_space<vmem>>, vector<8x256xf32>
    %c3_74 = arith.constant 3 : index
    %c0_75 = arith.constant 0 : index
    %c0_76 = arith.constant 0 : index
    %90 = vector.load %arg4[%c3_74, %c0_75, %c0_76] : memref<9x8x8xf32, #tpu.memory_space<vmem>>, vector<1x8x8xf32>
    %91 = vector.shape_cast %90 : vector<1x8x8xf32> to vector<8x8xf32>
    %cst_77 = arith.constant dense<0.000000e+00> : vector<8x256xf32>
    %92 = tpu.matmul %91, %89, %cst_77 {dimension_numbers = #tpu.dot_dimension_numbers<[1], [0], [0], [1], [0, 0, 1, 1], [], []>} : vector<8x8xf32>, vector<8x256xf32>, vector<8x256xf32> -> vector<8x256xf32>
    %93 = arith.addf %88, %92 : vector<8x256xf32>
    %c0_78 = arith.constant 0 : index
    %c145_79 = arith.constant 145 : index
    %94 = vector.load %arg11[%c0_78, %c145_79] : memref<8x512xf32, #tpu.memory_space<vmem>>, vector<8x256xf32>
    %c4_80 = arith.constant 4 : index
    %c0_81 = arith.constant 0 : index
    %c0_82 = arith.constant 0 : index
    %95 = vector.load %arg4[%c4_80, %c0_81, %c0_82] : memref<9x8x8xf32, #tpu.memory_space<vmem>>, vector<1x8x8xf32>
    %96 = vector.shape_cast %95 : vector<1x8x8xf32> to vector<8x8xf32>
    %cst_83 = arith.constant dense<0.000000e+00> : vector<8x256xf32>
    %97 = tpu.matmul %96, %94, %cst_83 {dimension_numbers = #tpu.dot_dimension_numbers<[1], [0], [0], [1], [0, 0, 1, 1], [], []>} : vector<8x8xf32>, vector<8x256xf32>, vector<8x256xf32> -> vector<8x256xf32>
    %98 = arith.addf %93, %97 : vector<8x256xf32>
    %c0_84 = arith.constant 0 : index
    %c146_85 = arith.constant 146 : index
    %99 = vector.load %arg11[%c0_84, %c146_85] : memref<8x512xf32, #tpu.memory_space<vmem>>, vector<8x256xf32>
    %c5_86 = arith.constant 5 : index
    %c0_87 = arith.constant 0 : index
    %c0_88 = arith.constant 0 : index
    %100 = vector.load %arg4[%c5_86, %c0_87, %c0_88] : memref<9x8x8xf32, #tpu.memory_space<vmem>>, vector<1x8x8xf32>
    %101 = vector.shape_cast %100 : vector<1x8x8xf32> to vector<8x8xf32>
    %cst_89 = arith.constant dense<0.000000e+00> : vector<8x256xf32>
    %102 = tpu.matmul %101, %99, %cst_89 {dimension_numbers = #tpu.dot_dimension_numbers<[1], [0], [0], [1], [0, 0, 1, 1], [], []>} : vector<8x8xf32>, vector<8x256xf32>, vector<8x256xf32> -> vector<8x256xf32>
    %103 = arith.addf %98, %102 : vector<8x256xf32>
    %c0_90 = arith.constant 0 : index
    %c160_91 = arith.constant 160 : index
    %104 = vector.load %arg11[%c0_90, %c160_91] : memref<8x512xf32, #tpu.memory_space<vmem>>, vector<8x256xf32>
    %c6_92 = arith.constant 6 : index
    %c0_93 = arith.constant 0 : index
    %c0_94 = arith.constant 0 : index
    %105 = vector.load %arg4[%c6_92, %c0_93, %c0_94] : memref<9x8x8xf32, #tpu.memory_space<vmem>>, vector<1x8x8xf32>
    %106 = vector.shape_cast %105 : vector<1x8x8xf32> to vector<8x8xf32>
    %cst_95 = arith.constant dense<0.000000e+00> : vector<8x256xf32>
    %107 = tpu.matmul %106, %104, %cst_95 {dimension_numbers = #tpu.dot_dimension_numbers<[1], [0], [0], [1], [0, 0, 1, 1], [], []>} : vector<8x8xf32>, vector<8x256xf32>, vector<8x256xf32> -> vector<8x256xf32>
    %108 = arith.addf %103, %107 : vector<8x256xf32>
    %c0_96 = arith.constant 0 : index
    %c161_97 = arith.constant 161 : index
    %109 = vector.load %arg11[%c0_96, %c161_97] : memref<8x512xf32, #tpu.memory_space<vmem>>, vector<8x256xf32>
    %c7_98 = arith.constant 7 : index
    %c0_99 = arith.constant 0 : index
    %c0_100 = arith.constant 0 : index
    %110 = vector.load %arg4[%c7_98, %c0_99, %c0_100] : memref<9x8x8xf32, #tpu.memory_space<vmem>>, vector<1x8x8xf32>
    %111 = vector.shape_cast %110 : vector<1x8x8xf32> to vector<8x8xf32>
    %cst_101 = arith.constant dense<0.000000e+00> : vector<8x256xf32>
    %112 = tpu.matmul %111, %109, %cst_101 {dimension_numbers = #tpu.dot_dimension_numbers<[1], [0], [0], [1], [0, 0, 1, 1], [], []>} : vector<8x8xf32>, vector<8x256xf32>, vector<8x256xf32> -> vector<8x256xf32>
    %113 = arith.addf %108, %112 : vector<8x256xf32>
    %c0_102 = arith.constant 0 : index
    %c162_103 = arith.constant 162 : index
    %114 = vector.load %arg11[%c0_102, %c162_103] : memref<8x512xf32, #tpu.memory_space<vmem>>, vector<8x256xf32>
    %c8_104 = arith.constant 8 : index
    %c0_105 = arith.constant 0 : index
    %c0_106 = arith.constant 0 : index
    %115 = vector.load %arg4[%c8_104, %c0_105, %c0_106] : memref<9x8x8xf32, #tpu.memory_space<vmem>>, vector<1x8x8xf32>
    %116 = vector.shape_cast %115 : vector<1x8x8xf32> to vector<8x8xf32>
    %cst_107 = arith.constant dense<0.000000e+00> : vector<8x256xf32>
    %117 = tpu.matmul %116, %114, %cst_107 {dimension_numbers = #tpu.dot_dimension_numbers<[1], [0], [0], [1], [0, 0, 1, 1], [], []>} : vector<8x8xf32>, vector<8x256xf32>, vector<8x256xf32> -> vector<8x256xf32>
    %118 = arith.addf %113, %117 : vector<8x256xf32>
    %c0_108 = arith.constant 0 : index
    %c0_109 = arith.constant 0 : index
    %119 = vector.load %arg5[%c0_108, %c0_109] : memref<8x1xf32, #tpu.memory_space<vmem>>, vector<8x1xf32>
    %120 = vector.broadcast %119 : vector<8x1xf32> to vector<8x256xf32>
    %121 = arith.addf %118, %120 : vector<8x256xf32>
    %cst_110 = arith.constant 0.000000e+00 : f32
    %122 = vector.broadcast %cst_110 : f32 to vector<8x256xf32>
    %123 = arith.maximumf %121, %122 : vector<8x256xf32>
    %c12_i32 = arith.constant 12 : i32
    %124 = vector.broadcast %c12_i32 : i32 to vector<1x256xi32>
    %125 = arith.cmpi slt, %2, %124 : vector<1x256xi32>
    %c12_i32_111 = arith.constant 12 : i32
    %126 = vector.broadcast %c12_i32_111 : i32 to vector<1x256xi32>
    %127 = arith.cmpi slt, %4, %126 : vector<1x256xi32>
    %128 = arith.andi %125, %127 : vector<1x256xi1>
    %cst_112 = arith.constant 0.000000e+00 : f32
    %129 = vector.shape_cast %128 : vector<1x256xi1> to vector<1x256xi1>
    %130 = vector.broadcast %129 : vector<1x256xi1> to vector<8x256xi1>
    %131 = vector.broadcast %cst_112 : f32 to vector<8x256xf32>
    %132 = arith.select %130, %123, %131 : vector<8x256xi1>, vector<8x256xf32>
    %c0_113 = arith.constant 0 : index
    %c128_114 = arith.constant 128 : index
    %133 = vector.load %arg11[%c0_113, %c128_114] : memref<8x512xf32, #tpu.memory_space<vmem>>, vector<8x256xf32>
    tpu.vector_store %arg11[%c0_113, %c128_114], %132 {strides = array<i32>} : memref<8x512xf32, #tpu.memory_space<vmem>>, vector<8x256xf32>,
    %cst_115 = arith.constant 0.000000e+00 : f32
    %134 = vector.broadcast %cst_115 : f32 to vector<8x256xf32>
    %c0_116 = arith.constant 0 : index
    %c128_117 = arith.constant 128 : index
    %135 = vector.load %arg11[%c0_116, %c128_117] : memref<8x512xf32, #tpu.memory_space<vmem>>, vector<8x256xf32>
    %c0_118 = arith.constant 0 : index
    %c0_119 = arith.constant 0 : index
    %c0_120 = arith.constant 0 : index
    %136 = vector.load %arg6[%c0_118, %c0_119, %c0_120] : memref<9x8x8xf32, #tpu.memory_space<vmem>>, vector<1x8x8xf32>
    %137 = vector.shape_cast %136 : vector<1x8x8xf32> to vector<8x8xf32>
    %cst_121 = arith.constant dense<0.000000e+00> : vector<8x256xf32>
    %138 = tpu.matmul %137, %135, %cst_121 {dimension_numbers = #tpu.dot_dimension_numbers<[1], [0], [0], [1], [0, 0, 1, 1], [], []>} : vector<8x8xf32>, vector<8x256xf32>, vector<8x256xf32> -> vector<8x256xf32>
    %139 = arith.addf %134, %138 : vector<8x256xf32>
    %c0_122 = arith.constant 0 : index
    %c127 = arith.constant 127 : index
    %140 = vector.load %arg11[%c0_122, %c127] : memref<8x512xf32, #tpu.memory_space<vmem>>, vector<8x256xf32>
    %c1_123 = arith.constant 1 : index
    %c0_124 = arith.constant 0 : index
    %c0_125 = arith.constant 0 : index
    %141 = vector.load %arg6[%c1_123, %c0_124, %c0_125] : memref<9x8x8xf32, #tpu.memory_space<vmem>>, vector<1x8x8xf32>
    %142 = vector.shape_cast %141 : vector<1x8x8xf32> to vector<8x8xf32>
    %cst_126 = arith.constant dense<0.000000e+00> : vector<8x256xf32>
    %143 = tpu.matmul %142, %140, %cst_126 {dimension_numbers = #tpu.dot_dimension_numbers<[1], [0], [0], [1], [0, 0, 1, 1], [], []>} : vector<8x8xf32>, vector<8x256xf32>, vector<8x256xf32> -> vector<8x256xf32>
    %144 = arith.addf %139, %143 : vector<8x256xf32>
    %c0_127 = arith.constant 0 : index
    %c126 = arith.constant 126 : index
    %145 = vector.load %arg11[%c0_127, %c126] : memref<8x512xf32, #tpu.memory_space<vmem>>, vector<8x256xf32>
    %c2_128 = arith.constant 2 : index
    %c0_129 = arith.constant 0 : index
    %c0_130 = arith.constant 0 : index
    %146 = vector.load %arg6[%c2_128, %c0_129, %c0_130] : memref<9x8x8xf32, #tpu.memory_space<vmem>>, vector<1x8x8xf32>
    %147 = vector.shape_cast %146 : vector<1x8x8xf32> to vector<8x8xf32>
    %cst_131 = arith.constant dense<0.000000e+00> : vector<8x256xf32>
    %148 = tpu.matmul %147, %145, %cst_131 {dimension_numbers = #tpu.dot_dimension_numbers<[1], [0], [0], [1], [0, 0, 1, 1], [], []>} : vector<8x8xf32>, vector<8x256xf32>, vector<8x256xf32> -> vector<8x256xf32>
    %149 = arith.addf %144, %148 : vector<8x256xf32>
    %c0_132 = arith.constant 0 : index
    %c112 = arith.constant 112 : index
    %150 = vector.load %arg11[%c0_132, %c112] : memref<8x512xf32, #tpu.memory_space<vmem>>, vector<8x256xf32>
    %c3_133 = arith.constant 3 : index
    %c0_134 = arith.constant 0 : index
    %c0_135 = arith.constant 0 : index
    %151 = vector.load %arg6[%c3_133, %c0_134, %c0_135] : memref<9x8x8xf32, #tpu.memory_space<vmem>>, vector<1x8x8xf32>
    %152 = vector.shape_cast %151 : vector<1x8x8xf32> to vector<8x8xf32>
    %cst_136 = arith.constant dense<0.000000e+00> : vector<8x256xf32>
    %153 = tpu.matmul %152, %150, %cst_136 {dimension_numbers = #tpu.dot_dimension_numbers<[1], [0], [0], [1], [0, 0, 1, 1], [], []>} : vector<8x8xf32>, vector<8x256xf32>, vector<8x256xf32> -> vector<8x256xf32>
    %154 = arith.addf %149, %153 : vector<8x256xf32>
    %c0_137 = arith.constant 0 : index
    %c111 = arith.constant 111 : index
    %155 = vector.load %arg11[%c0_137, %c111] : memref<8x512xf32, #tpu.memory_space<vmem>>, vector<8x256xf32>
    %c4_138 = arith.constant 4 : index
    %c0_139 = arith.constant 0 : index
    %c0_140 = arith.constant 0 : index
    %156 = vector.load %arg6[%c4_138, %c0_139, %c0_140] : memref<9x8x8xf32, #tpu.memory_space<vmem>>, vector<1x8x8xf32>
    %157 = vector.shape_cast %156 : vector<1x8x8xf32> to vector<8x8xf32>
    %cst_141 = arith.constant dense<0.000000e+00> : vector<8x256xf32>
    %158 = tpu.matmul %157, %155, %cst_141 {dimension_numbers = #tpu.dot_dimension_numbers<[1], [0], [0], [1], [0, 0, 1, 1], [], []>} : vector<8x8xf32>, vector<8x256xf32>, vector<8x256xf32> -> vector<8x256xf32>
    %159 = arith.addf %154, %158 : vector<8x256xf32>
    %c0_142 = arith.constant 0 : index
    %c110 = arith.constant 110 : index
    %160 = vector.load %arg11[%c0_142, %c110] : memref<8x512xf32, #tpu.memory_space<vmem>>, vector<8x256xf32>
    %c5_143 = arith.constant 5 : index
    %c0_144 = arith.constant 0 : index
    %c0_145 = arith.constant 0 : index
    %161 = vector.load %arg6[%c5_143, %c0_144, %c0_145] : memref<9x8x8xf32, #tpu.memory_space<vmem>>, vector<1x8x8xf32>
    %162 = vector.shape_cast %161 : vector<1x8x8xf32> to vector<8x8xf32>
    %cst_146 = arith.constant dense<0.000000e+00> : vector<8x256xf32>
    %163 = tpu.matmul %162, %160, %cst_146 {dimension_numbers = #tpu.dot_dimension_numbers<[1], [0], [0], [1], [0, 0, 1, 1], [], []>} : vector<8x8xf32>, vector<8x256xf32>, vector<8x256xf32> -> vector<8x256xf32>
    %164 = arith.addf %159, %163 : vector<8x256xf32>
    %c0_147 = arith.constant 0 : index
    %c96 = arith.constant 96 : index
    %165 = vector.load %arg11[%c0_147, %c96] : memref<8x512xf32, #tpu.memory_space<vmem>>, vector<8x256xf32>
    %c6_148 = arith.constant 6 : index
    %c0_149 = arith.constant 0 : index
    %c0_150 = arith.constant 0 : index
    %166 = vector.load %arg6[%c6_148, %c0_149, %c0_150] : memref<9x8x8xf32, #tpu.memory_space<vmem>>, vector<1x8x8xf32>
    %167 = vector.shape_cast %166 : vector<1x8x8xf32> to vector<8x8xf32>
    %cst_151 = arith.constant dense<0.000000e+00> : vector<8x256xf32>
    %168 = tpu.matmul %167, %165, %cst_151 {dimension_numbers = #tpu.dot_dimension_numbers<[1], [0], [0], [1], [0, 0, 1, 1], [], []>} : vector<8x8xf32>, vector<8x256xf32>, vector<8x256xf32> -> vector<8x256xf32>
    %169 = arith.addf %164, %168 : vector<8x256xf32>
    %c0_152 = arith.constant 0 : index
    %c95 = arith.constant 95 : index
    %170 = vector.load %arg11[%c0_152, %c95] : memref<8x512xf32, #tpu.memory_space<vmem>>, vector<8x256xf32>
    %c7_153 = arith.constant 7 : index
    %c0_154 = arith.constant 0 : index
    %c0_155 = arith.constant 0 : index
    %171 = vector.load %arg6[%c7_153, %c0_154, %c0_155] : memref<9x8x8xf32, #tpu.memory_space<vmem>>, vector<1x8x8xf32>
    %172 = vector.shape_cast %171 : vector<1x8x8xf32> to vector<8x8xf32>
    %cst_156 = arith.constant dense<0.000000e+00> : vector<8x256xf32>
    %173 = tpu.matmul %172, %170, %cst_156 {dimension_numbers = #tpu.dot_dimension_numbers<[1], [0], [0], [1], [0, 0, 1, 1], [], []>} : vector<8x8xf32>, vector<8x256xf32>, vector<8x256xf32> -> vector<8x256xf32>
    %174 = arith.addf %169, %173 : vector<8x256xf32>
    %c0_157 = arith.constant 0 : index
    %c94 = arith.constant 94 : index
    %175 = vector.load %arg11[%c0_157, %c94] : memref<8x512xf32, #tpu.memory_space<vmem>>, vector<8x256xf32>
    %c8_158 = arith.constant 8 : index
    %c0_159 = arith.constant 0 : index
    %c0_160 = arith.constant 0 : index
    %176 = vector.load %arg6[%c8_158, %c0_159, %c0_160] : memref<9x8x8xf32, #tpu.memory_space<vmem>>, vector<1x8x8xf32>
    %177 = vector.shape_cast %176 : vector<1x8x8xf32> to vector<8x8xf32>
    %cst_161 = arith.constant dense<0.000000e+00> : vector<8x256xf32>
    %178 = tpu.matmul %177, %175, %cst_161 {dimension_numbers = #tpu.dot_dimension_numbers<[1], [0], [0], [1], [0, 0, 1, 1], [], []>} : vector<8x8xf32>, vector<8x256xf32>, vector<8x256xf32> -> vector<8x256xf32>
    %179 = arith.addf %174, %178 : vector<8x256xf32>
    %c0_162 = arith.constant 0 : index
    %c0_163 = arith.constant 0 : index
    %180 = vector.load %arg7[%c0_162, %c0_163] : memref<8x1xf32, #tpu.memory_space<vmem>>, vector<8x1xf32>
    %181 = vector.broadcast %180 : vector<8x1xf32> to vector<8x256xf32>
    %182 = arith.addf %179, %181 : vector<8x256xf32>
    %cst_164 = arith.constant 0.000000e+00 : f32
    %183 = vector.broadcast %cst_164 : f32 to vector<8x256xf32>
    %184 = arith.maximumf %182, %183 : vector<8x256xf32>
    %c14_i32_165 = arith.constant 14 : i32
    %185 = vector.broadcast %c14_i32_165 : i32 to vector<1x256xi32>
    %186 = arith.cmpi slt, %2, %185 : vector<1x256xi32>
    %c14_i32_166 = arith.constant 14 : i32
    %187 = vector.broadcast %c14_i32_166 : i32 to vector<1x256xi32>
    %188 = arith.cmpi slt, %4, %187 : vector<1x256xi32>
    %189 = arith.andi %186, %188 : vector<1x256xi1>
    %cst_167 = arith.constant 0.000000e+00 : f32
    %190 = vector.shape_cast %189 : vector<1x256xi1> to vector<1x256xi1>
    %191 = vector.broadcast %190 : vector<1x256xi1> to vector<8x256xi1>
    %192 = vector.broadcast %cst_167 : f32 to vector<8x256xf32>
    %193 = arith.select %191, %184, %192 : vector<8x256xi1>, vector<8x256xf32>
    %c0_168 = arith.constant 0 : index
    %c128_169 = arith.constant 128 : index
    %194 = vector.load %arg11[%c0_168, %c128_169] : memref<8x512xf32, #tpu.memory_space<vmem>>, vector<8x256xf32>
    tpu.vector_store %arg11[%c0_168, %c128_169], %193 {strides = array<i32>} : memref<8x512xf32, #tpu.memory_space<vmem>>, vector<8x256xf32>,
    %cst_170 = arith.constant 0.000000e+00 : f32
    %195 = vector.broadcast %cst_170 : f32 to vector<8x256xf32>
    %c0_171 = arith.constant 0 : index
    %c128_172 = arith.constant 128 : index
    %196 = vector.load %arg11[%c0_171, %c128_172] : memref<8x512xf32, #tpu.memory_space<vmem>>, vector<8x256xf32>
    %c0_173 = arith.constant 0 : index
    %c0_174 = arith.constant 0 : index
    %c0_175 = arith.constant 0 : index
    %197 = vector.load %arg8[%c0_173, %c0_174, %c0_175] : memref<9x8x8xf32, #tpu.memory_space<vmem>>, vector<1x8x8xf32>
    %198 = vector.shape_cast %197 : vector<1x8x8xf32> to vector<8x8xf32>
    %cst_176 = arith.constant dense<0.000000e+00> : vector<8x256xf32>
    %199 = tpu.matmul %198, %196, %cst_176 {dimension_numbers = #tpu.dot_dimension_numbers<[1], [0], [0], [1], [0, 0, 1, 1], [], []>} : vector<8x8xf32>, vector<8x256xf32>, vector<8x256xf32> -> vector<8x256xf32>
    %200 = arith.addf %195, %199 : vector<8x256xf32>
    %c0_177 = arith.constant 0 : index
    %c127_178 = arith.constant 127 : index
    %201 = vector.load %arg11[%c0_177, %c127_178] : memref<8x512xf32, #tpu.memory_space<vmem>>, vector<8x256xf32>
    %c1_179 = arith.constant 1 : index
    %c0_180 = arith.constant 0 : index
    %c0_181 = arith.constant 0 : index
    %202 = vector.load %arg8[%c1_179, %c0_180, %c0_181] : memref<9x8x8xf32, #tpu.memory_space<vmem>>, vector<1x8x8xf32>
    %203 = vector.shape_cast %202 : vector<1x8x8xf32> to vector<8x8xf32>
    %cst_182 = arith.constant dense<0.000000e+00> : vector<8x256xf32>
    %204 = tpu.matmul %203, %201, %cst_182 {dimension_numbers = #tpu.dot_dimension_numbers<[1], [0], [0], [1], [0, 0, 1, 1], [], []>} : vector<8x8xf32>, vector<8x256xf32>, vector<8x256xf32> -> vector<8x256xf32>
    %205 = arith.addf %200, %204 : vector<8x256xf32>
    %c0_183 = arith.constant 0 : index
    %c126_184 = arith.constant 126 : index
    %206 = vector.load %arg11[%c0_183, %c126_184] : memref<8x512xf32, #tpu.memory_space<vmem>>, vector<8x256xf32>
    %c2_185 = arith.constant 2 : index
    %c0_186 = arith.constant 0 : index
    %c0_187 = arith.constant 0 : index
    %207 = vector.load %arg8[%c2_185, %c0_186, %c0_187] : memref<9x8x8xf32, #tpu.memory_space<vmem>>, vector<1x8x8xf32>
    %208 = vector.shape_cast %207 : vector<1x8x8xf32> to vector<8x8xf32>
    %cst_188 = arith.constant dense<0.000000e+00> : vector<8x256xf32>
    %209 = tpu.matmul %208, %206, %cst_188 {dimension_numbers = #tpu.dot_dimension_numbers<[1], [0], [0], [1], [0, 0, 1, 1], [], []>} : vector<8x8xf32>, vector<8x256xf32>, vector<8x256xf32> -> vector<8x256xf32>
    %210 = arith.addf %205, %209 : vector<8x256xf32>
    %c0_189 = arith.constant 0 : index
    %c112_190 = arith.constant 112 : index
    %211 = vector.load %arg11[%c0_189, %c112_190] : memref<8x512xf32, #tpu.memory_space<vmem>>, vector<8x256xf32>
    %c3_191 = arith.constant 3 : index
    %c0_192 = arith.constant 0 : index
    %c0_193 = arith.constant 0 : index
    %212 = vector.load %arg8[%c3_191, %c0_192, %c0_193] : memref<9x8x8xf32, #tpu.memory_space<vmem>>, vector<1x8x8xf32>
    %213 = vector.shape_cast %212 : vector<1x8x8xf32> to vector<8x8xf32>
    %cst_194 = arith.constant dense<0.000000e+00> : vector<8x256xf32>
    %214 = tpu.matmul %213, %211, %cst_194 {dimension_numbers = #tpu.dot_dimension_numbers<[1], [0], [0], [1], [0, 0, 1, 1], [], []>} : vector<8x8xf32>, vector<8x256xf32>, vector<8x256xf32> -> vector<8x256xf32>
    %215 = arith.addf %210, %214 : vector<8x256xf32>
    %c0_195 = arith.constant 0 : index
    %c111_196 = arith.constant 111 : index
    %216 = vector.load %arg11[%c0_195, %c111_196] : memref<8x512xf32, #tpu.memory_space<vmem>>, vector<8x256xf32>
    %c4_197 = arith.constant 4 : index
    %c0_198 = arith.constant 0 : index
    %c0_199 = arith.constant 0 : index
    %217 = vector.load %arg8[%c4_197, %c0_198, %c0_199] : memref<9x8x8xf32, #tpu.memory_space<vmem>>, vector<1x8x8xf32>
    %218 = vector.shape_cast %217 : vector<1x8x8xf32> to vector<8x8xf32>
    %cst_200 = arith.constant dense<0.000000e+00> : vector<8x256xf32>
    %219 = tpu.matmul %218, %216, %cst_200 {dimension_numbers = #tpu.dot_dimension_numbers<[1], [0], [0], [1], [0, 0, 1, 1], [], []>} : vector<8x8xf32>, vector<8x256xf32>, vector<8x256xf32> -> vector<8x256xf32>
    %220 = arith.addf %215, %219 : vector<8x256xf32>
    %c0_201 = arith.constant 0 : index
    %c110_202 = arith.constant 110 : index
    %221 = vector.load %arg11[%c0_201, %c110_202] : memref<8x512xf32, #tpu.memory_space<vmem>>, vector<8x256xf32>
    %c5_203 = arith.constant 5 : index
    %c0_204 = arith.constant 0 : index
    %c0_205 = arith.constant 0 : index
    %222 = vector.load %arg8[%c5_203, %c0_204, %c0_205] : memref<9x8x8xf32, #tpu.memory_space<vmem>>, vector<1x8x8xf32>
    %223 = vector.shape_cast %222 : vector<1x8x8xf32> to vector<8x8xf32>
    %cst_206 = arith.constant dense<0.000000e+00> : vector<8x256xf32>
    %224 = tpu.matmul %223, %221, %cst_206 {dimension_numbers = #tpu.dot_dimension_numbers<[1], [0], [0], [1], [0, 0, 1, 1], [], []>} : vector<8x8xf32>, vector<8x256xf32>, vector<8x256xf32> -> vector<8x256xf32>
    %225 = arith.addf %220, %224 : vector<8x256xf32>
    %c0_207 = arith.constant 0 : index
    %c96_208 = arith.constant 96 : index
    %226 = vector.load %arg11[%c0_207, %c96_208] : memref<8x512xf32, #tpu.memory_space<vmem>>, vector<8x256xf32>
    %c6_209 = arith.constant 6 : index
    %c0_210 = arith.constant 0 : index
    %c0_211 = arith.constant 0 : index
    %227 = vector.load %arg8[%c6_209, %c0_210, %c0_211] : memref<9x8x8xf32, #tpu.memory_space<vmem>>, vector<1x8x8xf32>
    %228 = vector.shape_cast %227 : vector<1x8x8xf32> to vector<8x8xf32>
    %cst_212 = arith.constant dense<0.000000e+00> : vector<8x256xf32>
    %229 = tpu.matmul %228, %226, %cst_212 {dimension_numbers = #tpu.dot_dimension_numbers<[1], [0], [0], [1], [0, 0, 1, 1], [], []>} : vector<8x8xf32>, vector<8x256xf32>, vector<8x256xf32> -> vector<8x256xf32>
    %230 = arith.addf %225, %229 : vector<8x256xf32>
    %c0_213 = arith.constant 0 : index
    %c95_214 = arith.constant 95 : index
    %231 = vector.load %arg11[%c0_213, %c95_214] : memref<8x512xf32, #tpu.memory_space<vmem>>, vector<8x256xf32>
    %c7_215 = arith.constant 7 : index
    %c0_216 = arith.constant 0 : index
    %c0_217 = arith.constant 0 : index
    %232 = vector.load %arg8[%c7_215, %c0_216, %c0_217] : memref<9x8x8xf32, #tpu.memory_space<vmem>>, vector<1x8x8xf32>
    %233 = vector.shape_cast %232 : vector<1x8x8xf32> to vector<8x8xf32>
    %cst_218 = arith.constant dense<0.000000e+00> : vector<8x256xf32>
    %234 = tpu.matmul %233, %231, %cst_218 {dimension_numbers = #tpu.dot_dimension_numbers<[1], [0], [0], [1], [0, 0, 1, 1], [], []>} : vector<8x8xf32>, vector<8x256xf32>, vector<8x256xf32> -> vector<8x256xf32>
    %235 = arith.addf %230, %234 : vector<8x256xf32>
    %c0_219 = arith.constant 0 : index
    %c94_220 = arith.constant 94 : index
    %236 = vector.load %arg11[%c0_219, %c94_220] : memref<8x512xf32, #tpu.memory_space<vmem>>, vector<8x256xf32>
    %c8_221 = arith.constant 8 : index
    %c0_222 = arith.constant 0 : index
    %c0_223 = arith.constant 0 : index
    %237 = vector.load %arg8[%c8_221, %c0_222, %c0_223] : memref<9x8x8xf32, #tpu.memory_space<vmem>>, vector<1x8x8xf32>
    %238 = vector.shape_cast %237 : vector<1x8x8xf32> to vector<8x8xf32>
    %cst_224 = arith.constant dense<0.000000e+00> : vector<8x256xf32>
    %239 = tpu.matmul %238, %236, %cst_224 {dimension_numbers = #tpu.dot_dimension_numbers<[1], [0], [0], [1], [0, 0, 1, 1], [], []>} : vector<8x8xf32>, vector<8x256xf32>, vector<8x256xf32> -> vector<8x256xf32>
    %240 = arith.addf %235, %239 : vector<8x256xf32>
    %c0_225 = arith.constant 0 : index
    %c0_226 = arith.constant 0 : index
    %241 = vector.load %arg9[%c0_225, %c0_226] : memref<8x1xf32, #tpu.memory_space<vmem>>, vector<8x1xf32>
    %242 = vector.broadcast %241 : vector<8x1xf32> to vector<8x256xf32>
    %243 = arith.addf %240, %242 : vector<8x256xf32>
    %cst_227 = arith.constant 0.000000e+00 : f32
    %244 = vector.broadcast %cst_227 : f32 to vector<8x256xf32>
    %245 = arith.maximumf %243, %244 : vector<8x256xf32>
    %246 = vector.extract_strided_slice %245 {offsets = [0, 0], sizes = [1, 256], strides = [1, 1]} : vector<8x256xf32> to vector<1x256xf32>
    %c0_228 = arith.constant 0 : index
    %c0_229 = arith.constant 0 : index
    %c0_230 = arith.constant 0 : index
    %247 = vector.load %arg10[%c0_228, %c0_229, %c0_230] : memref<1x1x256xf32, #tpu.memory_space<vmem>>, vector<1x1x256xf32>
    %248 = vector.shape_cast %247 : vector<1x1x256xf32> to vector<1x256xf32>
    %249 = vector.shape_cast %246 : vector<1x256xf32> to vector<1x1x256xf32>
    tpu.vector_store %arg10[%c0_228, %c0_229, %c0_230], %249 {strides = array<i32>} : memref<1x1x256xf32, #tpu.memory_space<vmem>>, vector<1x1x256xf32>,
    return
  }
  func.func @transform_0(%arg0: i32) -> (i32, i32, i32) {
    %c0_i32 = arith.constant 0 : i32
    %c0_i32_0 = arith.constant 0 : i32
    %c0_i32_1 = arith.constant 0 : i32
    return %arg0, %c0_i32, %c0_i32_0 : i32, i32, i32
  }
  func.func @transform_1(%arg0: i32) -> (i32, i32, i32) {
    %c0_i32 = arith.constant 0 : i32
    %c0_i32_0 = arith.constant 0 : i32
    %c0_i32_1 = arith.constant 0 : i32
    %c0_i32_2 = arith.constant 0 : i32
    return %c0_i32, %c0_i32_0, %c0_i32_1 : i32, i32, i32
  }
  func.func @transform_2(%arg0: i32) -> (i32, i32) {
    %c0_i32 = arith.constant 0 : i32
    %c0_i32_0 = arith.constant 0 : i32
    %c0_i32_1 = arith.constant 0 : i32
    return %c0_i32, %c0_i32_0 : i32, i32
  }
  func.func @transform_3(%arg0: i32) -> (i32, i32, i32) {
    %c0_i32 = arith.constant 0 : i32
    %c0_i32_0 = arith.constant 0 : i32
    %c0_i32_1 = arith.constant 0 : i32
    %c0_i32_2 = arith.constant 0 : i32
    return %c0_i32, %c0_i32_0, %c0_i32_1 : i32, i32, i32
  }
  func.func @transform_4(%arg0: i32) -> (i32, i32) {
    %c0_i32 = arith.constant 0 : i32
    %c0_i32_0 = arith.constant 0 : i32
    %c0_i32_1 = arith.constant 0 : i32
    return %c0_i32, %c0_i32_0 : i32, i32
  }
  func.func @transform_5(%arg0: i32) -> (i32, i32, i32) {
    %c0_i32 = arith.constant 0 : i32
    %c0_i32_0 = arith.constant 0 : i32
    %c0_i32_1 = arith.constant 0 : i32
    %c0_i32_2 = arith.constant 0 : i32
    return %c0_i32, %c0_i32_0, %c0_i32_1 : i32, i32, i32
  }
  func.func @transform_6(%arg0: i32) -> (i32, i32) {
    %c0_i32 = arith.constant 0 : i32
    %c0_i32_0 = arith.constant 0 : i32
    %c0_i32_1 = arith.constant 0 : i32
    return %c0_i32, %c0_i32_0 : i32, i32
  }
  func.func @transform_7(%arg0: i32) -> (i32, i32, i32) {
    %c0_i32 = arith.constant 0 : i32
    %c0_i32_0 = arith.constant 0 : i32
    %c0_i32_1 = arith.constant 0 : i32
    %c0_i32_2 = arith.constant 0 : i32
    return %c0_i32, %c0_i32_0, %c0_i32_1 : i32, i32, i32
  }
  func.func @transform_8(%arg0: i32) -> (i32, i32) {
    %c0_i32 = arith.constant 0 : i32
    %c0_i32_0 = arith.constant 0 : i32
    %c0_i32_1 = arith.constant 0 : i32
    return %c0_i32, %c0_i32_0 : i32, i32
  }
  func.func @transform_9(%arg0: i32) -> (i32, i32, i32) {
    %c0_i32 = arith.constant 0 : i32
    %c0_i32_0 = arith.constant 0 : i32
    %c0_i32_1 = arith.constant 0 : i32
    return %arg0, %c0_i32, %c0_i32_0 : i32, i32, i32
  }
}

</mosaic_0001>

<bundles_post_ra>
// kernel: net_forward.1
= control target key start
LH: loop header
LB: loop body
LE: loop exit
PB: predicated region body
PF: predicated region fallthrough
CT: control target
= control target key end

     0   :  { %s3836_s30 = smov 0   ;;  %s4327_s0 = inlined_call_operand.vmem [shape: f32[2,8,256], index: 0, kind: input, shape index: {}]   ;;  %s4328_s1 = inlined_call_operand.vmem [shape: f32[9,8,8], index: 1, kind: input, shape index: {}]   ;;  %s4329_s2 = inlined_call_operand.vmem [shape: f32[8,1], index: 2, kind: input, shape index: {}]   ;;  %s4330_s3 = inlined_call_operand.vmem [shape: f32[9,8,8], index: 3, kind: input, shape index: {}]   ;;  %s4331_s4 = inlined_call_operand.vmem [shape: f32[8,1], index: 4, kind: input, shape index: {}]   ;;  %s4332_s5 = inlined_call_operand.vmem [shape: f32[9,8,8], index: 5, kind: input, shape index: {}]   ;;  %s4333_s6 = inlined_call_operand.vmem [shape: f32[8,1], index: 6, kind: input, shape index: {}]   ;;  %s4334_s7 = inlined_call_operand.vmem [shape: f32[9,8,8], index: 7, kind: input, shape index: {}]   ;;  %s4335_s8 = inlined_call_operand.vmem [shape: f32[8,1], index: 8, kind: input, shape index: {}]   ;;  %s4336_s9 = inlined_call_operand.vmem [shape: f32[2,1,256], index: 9, kind: output, shape index: {}]  }
   0x1 LB: > { %s3645_s10 = sadd.s32 4294967295, %s3765_s30   ;;  %p3649_p0 = scmp.ge.s32.totalorder %s3765_s30, 1  ;;  %s3765_s30 = sphi %s3836_s30, %s19_s30  }
   0x2   : > { %p287_p1 = scmp.lt.s32.totalorder %s3765_s30, 3 }
   0x4   : > { %p288_p2 = pnand %p3649_p0, %p287_p1 }
   0x5   : > { %p322_p3 = scmp.lt.s32.totalorder (!%p288_p2), %s3645_s10, 1  ;;  %s3768_s11 = smov (!%p288_p2), 127  }
   0x6   : > { %291 = sbr.rel (%p288_p2) target bundleno = 1431 (0x597), region = 56  ;;  %s3769_s18 = smov (!%p288_p2), 126  }
   0x7   : > { %s3770_s19 = smov (!%p288_p2), 112   ;;  %s3771_s20 = smov (!%p288_p2), 111  }
   0x8   : > { %s3772_s21 = smov (!%p288_p2), 110   ;;  %s3773_s22 = smov (!%p288_p2), 96  }
   0x9   : > { %s3774_s23 = smov (!%p288_p2), 95   ;;  %s3776_s24 = smov (!%p288_p2), 94  }
   0xa   : > { %s3779_s16 = smov (!%p288_p2), 2  }
   0xb   : > { %v3767_v0 = vmov 0.0   ;;  %s4350_s10 = smov (!%p322_p3, %s3645_s10), 1  ;;  %v346_v3 = vld [vmem:[%s4328_s1] sm:$0xff]  ;;  %vm366_vm0 = vcmask 64512   ;;  %v3775_v4 = vmov 0   ;;  %vm361_vm1 = vcmask 1039360  }
   0xc   : > { %359 = vrot.lane.b32.xlu0 %v3767_v0, %s3768_s11  ;;  %434 = vmatprep.mubr.f32.mxu0 %v3767_v0  ;;  %s3723_s12 = sshll.u32 %s4350_s10, 4  ;;  %v1138_v5 = vld [vmem:[%s4329_s2] sm:$0xff]  ;;  %v3653_v11 = vld [vmem:[%s4328_s1 + $0x8] sm:$0xff]  ;;  %vm523_vm2 = vcmask 1031168   ;;  %v3656_v17 = vld [vmem:[%s4328_s1 + $0x10] sm:$0xff]  ;;  %vm612_vm3 = vcmask 916480  }
   0xd   : > { %508 = vmatprep.mubr.f32.mxu1 %v3767_v0  ;;  %s326_s15 = scalar_lea.vmem %s4327_s0, %s3723_s12  ;;  %3757 = vset.pattern.permute.xlu0 %v3775_v4  ;;  %v3658_v23 = vld [vmem:[%s4328_s1 + $0x18] sm:$0xff]  ;;  %vm701_vm4 = vcmask 908288   ;;  %v3660_v29 = vld [vmem:[%s4328_s1 + $0x20] sm:$0xff]  ;;  %vm790_vm5 = vcmask 900096   ;;  %v3662_v35 = vld [vmem:[%s4328_s1 + $0x28] sm:$0xff]  ;;  %vm879_vm6 = vcmask 785408  }
   0xe   : > { %v341_v1 = vld [vmem:[%s326_s15 + $0x8] sm:$0xff]  ;;  %v340_v2 = vld [vmem:[%s326_s15] sm:$0xff]  ;;  %3758 = vset.pattern.permute.xlu1 %v3775_v4  ;;  %v3664_v41 = vld [vmem:[%s4328_s1 + $0x30] sm:$0xff]  ;;  %vm968_vm7 = vcmask 777216   ;;  %vm1057_vm8 = vcmask 769024   ;;  %s3777_s15 = smov 1  }
   0xf   : > { %355 = vrot.lane.b32.xlu1 %v340_v2, %s3768_s11  ;;  %474 = vmatprep.subr.mxu1 %v341_v1  ;;  %v3666_v47 = vld [vmem:[%s4328_s1 + $0x38] sm:$0xff]  ;;  %v3668_v52 = vld [vmem:[%s4328_s1 + $0x40] sm:$0xff]  ;;  %s3652_s14 = sshll.u32 %s4350_s10, 1 }
  0x10   : > { %357 = vrot.lane.b32.xlu0 %v341_v1, %s3768_s11  ;;  %475 = vmatpush1.msra.mxu1 %v340_v2 }
  0x11   : > { %3655 = vmatmul.mubr.msk.f32.vlgmr.msra.gmra.mxu1 %vm366_vm0, %v346_v3 }
  0x12   : > { %684 = vmatprep.mubr.f32.mxu1 %v3767_v0 }
  0x13   : > { %519 = vrot.lane.b32.xlu1 %v341_v1, %s3769_s18 }
  0x14   : > { %521 = vrot.lane.b32.xlu0 %v3767_v0, %s3769_s18 }
  0x17   : > { %517 = vrot.lane.b32.xlu1 %v340_v2, %s3769_s18 }
  0x18   : > { %608 = vrot.lane.b32.xlu0 %v341_v1, %s3770_s19 }
  0x1b   : > { %610 = vrot.lane.b32.xlu1 %v3767_v0, %s3770_s19 }
  0x1c   : > { %606 = vrot.lane.b32.xlu0 %v340_v2, %s3770_s19 }
  0x1f   : > { %697 = vrot.lane.b32.xlu1 %v341_v1, %s3771_s20 }
  0x20   : > { %699 = vrot.lane.b32.xlu0 %v3767_v0, %s3771_s20 }
  0x23   : > { %695 = vrot.lane.b32.xlu1 %v340_v2, %s3771_s20 }
  0x24   : > { %786 = vrot.lane.b32.xlu0 %v341_v1, %s3772_s21 }
  0x27   : > { %788 = vrot.lane.b32.xlu1 %v3767_v0, %s3772_s21 }
  0x28   : > { %784 = vrot.lane.b32.xlu0 %v340_v2, %s3772_s21 }
  0x2b   : > { %875 = vrot.lane.b32.xlu1 %v341_v1, %s3773_s22 }
  0x2c   : > { %877 = vrot.lane.b32.xlu0 %v3767_v0, %s3773_s22 }
  0x2f   : > { %873 = vrot.lane.b32.xlu1 %v340_v2, %s3773_s22 }
  0x30   : > { %964 = vrot.lane.b32.xlu0 %v341_v1, %s3774_s23 }
  0x33   : > { %966 = vrot.lane.b32.xlu1 %v3767_v0, %s3774_s23 }
  0x34   : > { %962 = vrot.lane.b32.xlu0 %v340_v2, %s3774_s23 }
  0x37   : > { %1053 = vrot.lane.b32.xlu1 %v341_v1, %s3776_s24 }
  0x38   : > { %1055 = vrot.lane.b32.xlu0 %v3767_v0, %s3776_s24 }
  0x3b   : > { %1051 = vrot.lane.b32.xlu1 %v340_v2, %s3776_s24 }
  0x3c   : > { %1141 = vperm.xlu0 %3757, %v1138_v5  }
  0x3f   : > { %1177 = vrot.lane.b32.xlu1 %v3767_v0, %s3768_s11 }
  0x40   : > { %1337 = vrot.lane.b32.xlu0 %v3767_v0, %s3769_s18 }
  0x43   : > { %1425 = vrot.lane.b32.xlu1 %v3767_v0, %s3770_s19 }
  0x44   : > { %1513 = vrot.lane.b32.xlu0 %v3767_v0, %s3771_s20 }
  0x47   : > { %1601 = vrot.lane.b32.xlu1 %v3767_v0, %s3772_s21 }
  0x48   : > { %1689 = vrot.lane.b32.xlu0 %v3767_v0, %s3773_s22 }
  0x4b   : > { %1777 = vrot.lane.b32.xlu1 %v3767_v0, %s3774_s23 }
  0x7e   : > { %v360_v6 = vpop.permute.xlu0 %359 }
  0x81   : > { %v356_v8 = vpop.permute.xlu1 %355 }
  0x82   : > { %v358_v7 = vpop.permute.xlu0 %357 }
  0x83   : > { %v363_v9 = vsel %vm361_vm1, %v358_v7, %v360_v6  ;;  %v362_v10 = vsel %vm361_vm1, %v356_v8, %v358_v7 }
  0x84   : > { %400 = vmatprep.subr.mxu0 %v363_v9  ;;  %v331_v9 = vlaneseq }
  0x85   : > { %401 = vmatpush1.msra.mxu0 %v362_v10  ;;  %v520_v13 = vpop.permute.xlu1 %519 }
  0x86   : > { %v522_v12 = vpop.permute.xlu0 %521  ;;  %3654 = vmatmul.mubr.msk.f32.vlgmr.msra.gmra.mxu0 %vm366_vm0, %v3653_v11 }
  0x87   : > { %v525_v14 = vsel %vm523_vm2, %v520_v13, %v522_v12  ;;  %595 = vmatprep.mubr.f32.mxu0 %v3767_v0 }
  0x88   : > { %561 = vmatprep.subr.mxu0 %v525_v14  ;;  %v3963_v14 = vand.u32 127, %v331_v9 }
  0x89   : > { %v518_v16 = vpop.permute.xlu1 %517 }
  0x8a   : > { %v609_v15 = vpop.permute.xlu0 %608  ;;  %v524_v18 = vsel %vm523_vm2, %v518_v16, %v520_v13 }
  0x8b   : > { %562 = vmatpush1.msra.mxu0 %v524_v18 }
  0x8c   : > { %3657 = vmatmul.mubr.msk.f32.vlgmr.msra.gmra.mxu0 %vm366_vm0, %v3656_v17 }
  0x8d   : > { %v611_v20 = vpop.permute.xlu1 %610  ;;  %773 = vmatprep.mubr.f32.mxu0 %v3767_v0 }
  0x8e   : > { %v607_v19 = vpop.permute.xlu0 %606  ;;  %v614_v22 = vsel %vm612_vm3, %v609_v15, %v611_v20 }
  0x8f   : > { %v613_v21 = vsel %vm612_vm3, %v607_v19, %v609_v15  ;;  %650 = vmatprep.subr.mxu1 %v614_v22  ;;  %v3966_v19 = vadd.s32 128, %v3963_v14  ;;  %v336_v22 = vand.u32 15, %v3963_v14 }
  0x90   : > { %651 = vmatpush1.msra.mxu1 %v613_v21  ;;  %v334_v21 = vshra.s32 %v3963_v14, 4 }
  0x91   : > { %v698_v25 = vpop.permute.xlu1 %697  ;;  %3659 = vmatmul.mubr.msk.f32.vlgmr.msra.gmra.mxu1 %vm366_vm0, %v3658_v23  ;;  %vm1150_vm10 = vcmp.lt.s32.totalorder %v336_v22, 14 }
  0x92   : > { %v700_v24 = vpop.permute.xlu0 %699  ;;  %862 = vmatprep.mubr.f32.mxu1 %v3767_v0  ;;  %vm1148_vm9 = vcmp.lt.s32.totalorder %v334_v21, 14  ;;  %vm4094_vm15 = vcmp.lt.s32.totalorder %v334_v21, 12 }
  0x93   : > { %v703_v26 = vsel %vm701_vm4, %v698_v25, %v700_v24  ;;  %vm3980_vm13 = vmand %vm1148_vm9, %vm1150_vm10  ;;  %vm2325_vm9 = vcmask 138240   ;;  %vm2414_vm10 = vcmask 146432  }
  0x94   : > { %739 = vmatprep.subr.mxu0 %v703_v26  ;;  %v337_v26 = vand.u32 15, %v3966_v19 }
  0x95   : > { %v696_v28 = vpop.permute.xlu1 %695 }
  0x96   : > { %v787_v27 = vpop.permute.xlu0 %786  ;;  %v702_v30 = vsel %vm701_vm4, %v696_v28, %v698_v25  ;;  %v335_v25 = vshra.s32 %v3966_v19, 4  ;;  %vm1151_vm12 = vcmp.lt.s32.totalorder %v337_v26, 14  ;;  %v1973_v19 = vld [vmem:[%s4332_s5] sm:$0xff] }
  0x97   : > { %740 = vmatpush1.msra.mxu0 %v702_v30 }
  0x98   : > { %3661 = vmatmul.mubr.msk.f32.vlgmr.msra.gmra.mxu0 %vm366_vm0, %v3660_v29  ;;  %vm1149_vm11 = vcmp.lt.s32.totalorder %v335_v25, 14 }
  0x99   : > { %v789_v32 = vpop.permute.xlu1 %788  ;;  %951 = vmatprep.mubr.f32.mxu0 %v3767_v0  ;;  %vm3984_vm14 = vmand %vm1149_vm11, %vm1151_vm12  ;;  %vm2503_vm11 = vcmask 261120   ;;  %vm2681_vm12 = vcmask 277504  }
  0x9a   : > { %v785_v31 = vpop.permute.xlu0 %784  ;;  %v792_v34 = vsel %vm790_vm5, %v787_v27, %v789_v32 }
  0x9b   : > { %v791_v33 = vsel %vm790_vm5, %v785_v31, %v787_v27  ;;  %828 = vmatprep.subr.mxu1 %v792_v34 }
  0x9c   : > { %829 = vmatpush1.msra.mxu1 %v791_v33 }
  0x9d   : > { %v876_v37 = vpop.permute.xlu1 %875  ;;  %3663 = vmatmul.mubr.msk.f32.vlgmr.msra.gmra.mxu1 %vm366_vm0, %v3662_v35 }
  0x9e   : > { %v878_v36 = vpop.permute.xlu0 %877  ;;  %1040 = vmatprep.mubr.f32.mxu1 %v3767_v0 }
  0x9f   : > { %v881_v38 = vsel %vm879_vm6, %v876_v37, %v878_v36 }
  0xa0   : > { %917 = vmatprep.subr.mxu0 %v881_v38 }
  0xa1   : > { %v874_v40 = vpop.permute.xlu1 %873 }
  0xa2   : > { %v965_v39 = vpop.permute.xlu0 %964  ;;  %v880_v42 = vsel %vm879_vm6, %v874_v40, %v876_v37  ;;  %v1164_v40 = vld [vmem:[%s4330_s3] sm:$0xff] }
  0xa3   : > { %918 = vmatpush1.msra.mxu0 %v880_v42  ;;  %v1947_v42 = vld [vmem:[%s4331_s4] sm:$0xff] }
  0xa4   : > { %3665 = vmatmul.mubr.msk.f32.vlgmr.msra.gmra.mxu0 %vm366_vm0, %v3664_v41  ;;  %v3559_v37 = vld [vmem:[%s4335_s8] sm:$0xff] }
  0xa5   : > { %v967_v44 = vpop.permute.xlu1 %966  ;;  %1129 = vmatprep.mubr.f32.mxu0 %v3767_v0 }
  0xa6   : > { %v963_v43 = vpop.permute.xlu0 %962  ;;  %v970_v46 = vsel %vm968_vm7, %v965_v39, %v967_v44 }
  0xa7   : > { %v969_v45 = vsel %vm968_vm7, %v963_v43, %v965_v39  ;;  %1006 = vmatprep.subr.mxu1 %v970_v46 }
  0xa8   : > { %1007 = vmatpush1.msra.mxu1 %v969_v45 }
  0xa9   : > { %v1054_v49 = vpop.permute.xlu1 %1053  ;;  %3667 = vmatmul.mubr.msk.f32.vlgmr.msra.gmra.mxu1 %vm366_vm0, %v3666_v47 }
  0xaa   : > { %v1056_v48 = vpop.permute.xlu0 %1055  ;;  %1250 = vmatprep.mubr.f32.mxu1 %v3767_v0 }
  0xab   : > { %v1059_v50 = vsel %vm1057_vm8, %v1054_v49, %v1056_v48 }
  0xac   : > { %1095 = vmatprep.subr.mxu0 %v1059_v50 }
  0xad   : > { %v1052_v51 = vpop.permute.xlu1 %1051 }
  0xae   : > { %v1058_v53 = vsel %vm1057_vm8, %v1052_v51, %v1054_v49 }
  0xaf   : > { %1096 = vmatpush1.msra.mxu0 %v1058_v53 }
  0xb0   : > { %3669 = vmatmul.mubr.msk.f32.vlgmr.msra.gmra.mxu0 %vm366_vm0, %v3668_v52 }
  0xb1   : > { %1324 = vmatprep.mubr.f32.mxu0 %v3767_v0  ;;  %v1178_v43 = vpop.permute.xlu1 %1177 }
  0xb5   : > { %v1426_v45 = vpop.permute.xlu1 %1425 }
  0xb7   : > { %v1142_v28 = vpop.permute.xlu0 %1141 }
  0xb9   : > { %v1602_v47 = vpop.permute.xlu1 %1601 }
  0xbb   : > { %v1338_v44 = vpop.permute.xlu0 %1337 }
  0xbd   : > { %v1778_v49 = vpop.permute.xlu1 %1777 }
  0xbf   : > { %v1514_v46 = vpop.permute.xlu0 %1513 }
  0xc3   : > { %v1690_v48 = vpop.permute.xlu0 %1689 }
  0xd1   : > { %v510_v56 = vpop.f32.mrf.mxu1 }
  0xd3   : > { %v512_v57 = vpop.f32.mrf.mxu1 }
 0x146   : > { %v436_v54 = vpop.f32.mrf.mxu0 }
 0x147   : > { %v511_v59 = vadd.f32 %v510_v56, %v436_v54 }
 0x148   : > { %v438_v55 = vpop.f32.mrf.mxu0 }
 0x149   : > { %v513_v60 = vadd.f32 %v512_v57, %v438_v55 }
 0x14c   : > { %v597_v58 = vpop.f32.mrf.mxu0 }
 0x14d   : > { %v602_v63 = vadd.f32 %v597_v58, %v511_v59 }
 0x14e   : > { %v599_v61 = vpop.f32.mrf.mxu0 }
 0x14f   : > { %v603_v1 = vadd.f32 %v599_v61, %v513_v60  ;;  %v3670_v60 = vld [vmem:[%s4330_s3 + $0x8] sm:$0xff] }
 0x151   : > { %v686_v62 = vpop.f32.mrf.mxu1 }
 0x152   : > { %v691_v4 = vadd.f32 %v686_v62, %v602_v63 }
 0x153   : > { %v688_v2 = vpop.f32.mrf.mxu1 }
 0x154   : > { %v692_v5 = vadd.f32 %v688_v2, %v603_v1 }
 0x158   : > { %v775_v3 = vpop.f32.mrf.mxu0 }
 0x159   : > { %v780_v8 = vadd.f32 %v775_v3, %v691_v4  ;;  %v3673_v4 = vld [vmem:[%s4330_s3 + $0x10] sm:$0xff] }
 0x15a   : > { %v777_v6 = vpop.f32.mrf.mxu0 }
 0x15b   : > { %v781_v10 = vadd.f32 %v777_v6, %v692_v5  ;;  %v3675_v5 = vld [vmem:[%s4330_s3 + $0x18] sm:$0xff] }
 0x15d   : > { %v864_v7 = vpop.f32.mrf.mxu1 }
 0x15e   : > { %v869_v13 = vadd.f32 %v864_v7, %v780_v8 }
 0x15f   : > { %v866_v11 = vpop.f32.mrf.mxu1 }
 0x160   : > { %v870_v15 = vadd.f32 %v866_v11, %v781_v10 }
 0x164   : > { %v953_v12 = vpop.f32.mrf.mxu0 }
 0x165   : > { %v958_v18 = vadd.f32 %v953_v12, %v869_v13  ;;  %v3677_v13 = vld [vmem:[%s4330_s3 + $0x20] sm:$0xff] }
 0x166   : > { %v955_v16 = vpop.f32.mrf.mxu0 }
 0x167   : > { %v959_v20 = vadd.f32 %v955_v16, %v870_v15  ;;  %v3679_v15 = vld [vmem:[%s4330_s3 + $0x28] sm:$0xff] }
 0x169   : > { %v1042_v17 = vpop.f32.mrf.mxu1 }
 0x16a   : > { %v1047_v24 = vadd.f32 %v1042_v17, %v958_v18 }
 0x16b   : > { %v1044_v23 = vpop.f32.mrf.mxu1 }
 0x16c   : > { %v1048_v29 = vadd.f32 %v1044_v23, %v959_v20 }
 0x170   : > { %v1131_v27 = vpop.f32.mrf.mxu0 }
 0x171   : > { %v1136_v30 = vadd.f32 %v1131_v27, %v1047_v24  ;;  %v3681_v27 = vld [vmem:[%s4330_s3 + $0x30] sm:$0xff] }
 0x172   : > { %v1133_v31 = vpop.f32.mrf.mxu0 }
 0x173   : > { %v1144_v32 = vadd.f32 %v1142_v28, %v1136_v30  ;;  %v1137_v33 = vadd.f32 %v1133_v31, %v1048_v29 }
 0x175   : > { %v1146_v35 = vmax.f32 %v1144_v32, 0.0  ;;  %v1145_v36 = vadd.f32 %v1142_v28, %v1137_v33  ;;  %v3683_v28 = vld [vmem:[%s4330_s3 + $0x38] sm:$0xff]  ;;  %v3685_v33 = vld [vmem:[%s4330_s3 + $0x40] sm:$0xff] }
 0x177   : > { %v1158_v38 = vsel %vm3980_vm13, %v1146_v35, 0.0  ;;  %v1147_v39 = vmax.f32 %v1145_v36, 0.0 }
 0x178   : > { %1333 = vrot.lane.b32.xlu1 %v1158_v38, %s3769_s18  ;;  %1173 = vrot.lane.b32.xlu0 %v1158_v38, %s3768_s11 }
 0x179   : > { %3724 = vmatprep.subr.msk.mxu0 %vm3984_vm14, %v1147_v39  ;;  %v1159_v41 = vsel %vm3984_vm14, %v1147_v39, 0.0 }
 0x17a   : > { %3725 = vmatpush1.msk.msra.mxu0 %vm3980_vm13, %v1146_v35 }
 0x17b   : > { %3672 = vmatmul.mubr.msk.f32.vlgmr.msra.gmra.mxu0 %vm366_vm0, %v1164_v40 }
 0x17c   : > { %1509 = vrot.lane.b32.xlu1 %v1158_v38, %s3771_s20  ;;  %1421 = vrot.lane.b32.xlu0 %v1158_v38, %s3770_s19 }
 0x17d   : > { %1498 = vmatprep.mubr.f32.mxu0 %v3767_v0 }
 0x180   : > { %1685 = vrot.lane.b32.xlu1 %v1158_v38, %s3773_s22  ;;  %1597 = vrot.lane.b32.xlu0 %v1158_v38, %s3772_s21 }
 0x184   : > { %1175 = vrot.lane.b32.xlu1 %v1159_v41, %s3768_s11  ;;  %1773 = vrot.lane.b32.xlu0 %v1158_v38, %s3774_s23  ;;  %s3778_s11 = smov 16  }
 0x188   : > { %1335 = vrot.lane.b32.xlu1 %v1159_v41, %s3769_s18  ;;  %1423 = vrot.lane.b32.xlu0 %v1159_v41, %s3770_s19  ;;  %s3780_s18 = smov 18   ;;  %s3781_s19 = smov 17  }
 0x18c   : > { %1511 = vrot.lane.b32.xlu1 %v1159_v41, %s3771_s20  ;;  %1599 = vrot.lane.b32.xlu0 %v1159_v41, %s3772_s21  ;;  %s3782_s20 = smov 33   ;;  %s3783_s21 = smov 32  }
 0x190   : > { %1687 = vrot.lane.b32.xlu1 %v1159_v41, %s3773_s22  ;;  %1775 = vrot.lane.b32.xlu0 %v1159_v41, %s3774_s23 }
 0x194   : > { %1863 = vrot.lane.b32.xlu1 %v1159_v41, %s3776_s24  ;;  %1865 = vrot.lane.b32.xlu0 %v3767_v0, %s3776_s24 }
 0x198   : > { %1861 = vrot.lane.b32.xlu1 %v1158_v38, %s3776_s24  ;;  %1950 = vperm.xlu0 %3757, %v1947_v42   ;;  %s3784_s24 = smov 34  }
 0x19c   : > { %1980 = vrot.lane.b32.xlu1 %v3767_v0, %s3777_s15  ;;  %2141 = vrot.lane.b32.xlu0 %v3767_v0, %s3779_s16 }
 0x1a0   : > { %2230 = vrot.lane.b32.xlu1 %v3767_v0, %s3778_s11  ;;  %2319 = vrot.lane.b32.xlu0 %v3767_v0, %s3781_s19 }
 0x1a4   : > { %2408 = vrot.lane.b32.xlu1 %v3767_v0, %s3780_s18  ;;  %2497 = vrot.lane.b32.xlu0 %v3767_v0, %s3783_s21 }
 0x1a8   : > { %2586 = vrot.lane.b32.xlu1 %v3767_v0, %s3782_s20 }
 0x1ea   : > { %v1334_v50 = vpop.permute.xlu1 %1333  ;;  %v1174_v51 = vpop.permute.xlu0 %1173 }
 0x1ee   : > { %v1510_v52 = vpop.permute.xlu1 %1509  ;;  %v1422_v53 = vpop.permute.xlu0 %1421 }
 0x1f2   : > { %v1686_v54 = vpop.permute.xlu1 %1685  ;;  %v1598_v55 = vpop.permute.xlu0 %1597 }
 0x1f6   : > { %v1176_v56 = vpop.permute.xlu1 %1175  ;;  %v1774_v57 = vpop.permute.xlu0 %1773 }
 0x1f7   : > { %v1179_v58 = vsel %vm361_vm1, %v1174_v51, %v1176_v56  ;;  %v1180_v59 = vsel %vm361_vm1, %v1176_v56, %v1178_v43  ;;  %vm4100_vm1 = vcmp.lt.s32.totalorder %v336_v22, 12 }
 0x1f8   : > { %1216 = vmatprep.subr.mxu1 %v1180_v59 }
 0x1f9   : > { %1217 = vmatpush1.msra.mxu1 %v1179_v58 }
 0x1fa   : > { %v1336_v61 = vpop.permute.xlu1 %1335  ;;  %3671 = vmatmul.mubr.msk.f32.vlgmr.msra.gmra.mxu1 %vm366_vm0, %v3670_v60  ;;  %v1424_v62 = vpop.permute.xlu0 %1423 }
 0x1fb   : > { %v1339_v63 = vsel %vm523_vm2, %v1334_v50, %v1336_v61  ;;  %v1427_v1 = vsel %vm612_vm3, %v1422_v53, %v1424_v62  ;;  %v1340_v2 = vsel %vm523_vm2, %v1336_v61, %v1338_v44  ;;  %v1428_v3 = vsel %vm612_vm3, %v1424_v62, %v1426_v45  ;;  %1410 = vmatprep.mubr.f32.mxu1 %v3767_v0 }
 0x1fc   : > { %1376 = vmatprep.subr.mxu1 %v1340_v2  ;;  %1464 = vmatprep.subr.mxu0 %v1428_v3  ;;  %vm4106_vm2 = vcmp.lt.s32.totalorder %v335_v25, 12  ;;  %vm4112_vm3 = vcmp.lt.s32.totalorder %v337_v26, 12 }
 0x1fd   : > { %1377 = vmatpush1.msra.mxu1 %v1339_v63  ;;  %1465 = vmatpush1.msra.mxu0 %v1427_v1 }
 0x1fe   : > { %v1512_v6 = vpop.permute.xlu1 %1511  ;;  %3674 = vmatmul.mubr.msk.f32.vlgmr.msra.gmra.mxu1 %vm366_vm0, %v3673_v4  ;;  %v1600_v7 = vpop.permute.xlu0 %1599  ;;  %3676 = vmatmul.mubr.msk.f32.vlgmr.msra.gmra.mxu0 %vm366_vm0, %v3675_v5 }
 0x1ff   : > { %v1515_v8 = vsel %vm701_vm4, %v1510_v52, %v1512_v6  ;;  %v1603_v10 = vsel %vm790_vm5, %v1598_v55, %v1600_v7  ;;  %v1516_v11 = vsel %vm701_vm4, %v1512_v6, %v1514_v46  ;;  %v1604_v12 = vsel %vm790_vm5, %v1600_v7, %v1602_v47  ;;  %1586 = vmatprep.mubr.f32.mxu1 %v3767_v0  ;;  %vm1961_vm4 = vmand %vm4094_vm15, %vm4100_vm1  ;;  %v3702_v7 = vld [vmem:[%s4332_s5 + $0x40] sm:$0xff] }
 0x200   : > { %1552 = vmatprep.subr.mxu1 %v1516_v11  ;;  %1640 = vmatprep.subr.mxu0 %v1604_v12  ;;  %vm1962_vm5 = vmand %vm4106_vm2, %vm4112_vm3  ;;  %vm2592_vm15 = vcmask 269312  }
 0x201   : > { %1553 = vmatpush1.msra.mxu1 %v1515_v8  ;;  %1641 = vmatpush1.msra.mxu0 %v1603_v10 }
 0x202   : > { %v1688_v16 = vpop.permute.xlu1 %1687  ;;  %3678 = vmatmul.mubr.msk.f32.vlgmr.msra.gmra.mxu1 %vm366_vm0, %v3677_v13  ;;  %v1776_v17 = vpop.permute.xlu0 %1775  ;;  %1674 = vmatprep.mubr.f32.mxu0 %v3767_v0 }
 0x203   : > { %v1691_v18 = vsel %vm879_vm6, %v1686_v54, %v1688_v16  ;;  %v1779_v20 = vsel %vm968_vm7, %v1774_v57, %v1776_v17  ;;  %3680 = vmatmul.mubr.msk.f32.vlgmr.msra.gmra.mxu0 %vm366_vm0, %v3679_v15  ;;  %v1692_v23 = vsel %vm879_vm6, %v1688_v16, %v1690_v48  ;;  %v1780_v24 = vsel %vm968_vm7, %v1776_v17, %v1778_v49  ;;  %v2762_v16 = vld [vmem:[%s4333_s6] sm:$0xff] }
 0x204   : > { %1728 = vmatprep.subr.mxu1 %v1692_v23  ;;  %1816 = vmatprep.subr.mxu0 %v1780_v24  ;;  %vm1986_vm6 = vcmask 7168   ;;  %vm2147_vm7 = vcmask 15360  }
 0x205   : > { %1729 = vmatpush1.msra.mxu1 %v1691_v18  ;;  %1762 = vmatprep.mubr.f32.mxu1 %v3767_v0 }
 0x206   : > { %1817 = vmatpush1.msra.mxu0 %v1779_v20  ;;  %v1864_v29 = vpop.permute.xlu1 %1863  ;;  %3682 = vmatmul.mubr.msk.f32.vlgmr.msra.gmra.mxu1 %vm366_vm0, %v3681_v27  ;;  %v1866_v30 = vpop.permute.xlu0 %1865 }
 0x207   : > { %1850 = vmatprep.mubr.f32.mxu0 %v3767_v0  ;;  %v1868_v31 = vsel %vm1057_vm8, %v1864_v29, %v1866_v30  ;;  %1938 = vmatprep.mubr.f32.mxu1 %v3767_v0 }
 0x208   : > { %3684 = vmatmul.mubr.msk.f32.vlgmr.msra.gmra.mxu0 %vm366_vm0, %v3683_v28  ;;  %1904 = vmatprep.subr.mxu1 %v1868_v31 }
 0x209   : > { %2058 = vmatprep.mubr.f32.mxu0 %v3767_v0 }
 0x20a   : > { %v1862_v32 = vpop.permute.xlu1 %1861 }
 0x20b   : > { %v1867_v35 = vsel %vm1057_vm8, %v1862_v32, %v1864_v29  ;;  %vm2236_vm8 = vcmask 130048  }
 0x20c   : > { %1905 = vmatpush1.msra.mxu1 %v1867_v35 }
 0x20d   : > { %3686 = vmatmul.mubr.msk.f32.vlgmr.msra.gmra.mxu1 %vm366_vm0, %v3685_v33 }
 0x20e   : > { %2132 = vmatprep.mubr.f32.mxu1 %v3767_v0  ;;  %v1981_v17 = vpop.permute.xlu1 %1980 }
 0x212   : > { %v2231_v18 = vpop.permute.xlu1 %2230 }
 0x213   : > { %v1951_v8 = vpop.permute.xlu0 %1950 }
 0x216   : > { %v2409_v23 = vpop.permute.xlu1 %2408 }
 0x217   : > { %v2142_v20 = vpop.permute.xlu0 %2141 }
 0x21a   : > { %v4164_v27 = vpop.permute.xlu1 %2586 }
 0x21b   : > { %v2320_v24 = vpop.permute.xlu0 %2319 }
 0x21f   : > { %v2498_v28 = vpop.permute.xlu0 %2497 }
 0x23b   : > { %v1326_v36 = vpop.f32.mrf.mxu0 }
 0x23d   : > { %v1328_v39 = vpop.f32.mrf.mxu0 }
 0x2ba   : > { %v1252_v38 = vpop.f32.mrf.mxu1 }
 0x2bb   : > { %v1327_v40 = vadd.f32 %v1326_v36, %v1252_v38 }
 0x2bc   : > { %v1254_v41 = vpop.f32.mrf.mxu1 }
 0x2bd   : > { %v1329_v42 = vadd.f32 %v1328_v39, %v1254_v41 }
 0x2be   : > { %v1412_v43 = vpop.f32.mrf.mxu1  ;;  %v1500_v44 = vpop.f32.mrf.mxu0 }
 0x2bf   : > { %v1417_v45 = vadd.f32 %v1412_v43, %v1327_v40  ;;  %v3687_v40 = vld [vmem:[%s4332_s5 + $0x8] sm:$0xff] }
 0x2c0   : > { %v1414_v46 = vpop.f32.mrf.mxu1  ;;  %v1502_v47 = vpop.f32.mrf.mxu0 }
 0x2c1   : > { %v1418_v48 = vadd.f32 %v1414_v46, %v1329_v42  ;;  %v1505_v49 = vadd.f32 %v1500_v44, %v1417_v45  ;;  %v3690_v45 = vld [vmem:[%s4332_s5 + $0x10] sm:$0xff] }
 0x2c2   : > { %v1588_v50 = vpop.f32.mrf.mxu1 }
 0x2c3   : > { %v1506_v51 = vadd.f32 %v1502_v47, %v1418_v48  ;;  %v1593_v52 = vadd.f32 %v1588_v50, %v1505_v49  ;;  %v1676_v53 = vpop.f32.mrf.mxu0 }
 0x2c4   : > { %v1590_v54 = vpop.f32.mrf.mxu1 }
 0x2c5   : > { %v1594_v55 = vadd.f32 %v1590_v54, %v1506_v51  ;;  %v1681_v56 = vadd.f32 %v1676_v53, %v1593_v52  ;;  %v1678_v57 = vpop.f32.mrf.mxu0  ;;  %v3692_v51 = vld [vmem:[%s4332_s5 + $0x18] sm:$0xff]  ;;  %v3694_v52 = vld [vmem:[%s4332_s5 + $0x20] sm:$0xff] }
 0x2c6   : > { %v1764_v58 = vpop.f32.mrf.mxu1 }
 0x2c7   : > { %v1682_v59 = vadd.f32 %v1678_v57, %v1594_v55  ;;  %v1769_v60 = vadd.f32 %v1764_v58, %v1681_v56 }
 0x2c8   : > { %v1766_v61 = vpop.f32.mrf.mxu1  ;;  %v1852_v62 = vpop.f32.mrf.mxu0 }
 0x2c9   : > { %v1770_v63 = vadd.f32 %v1766_v61, %v1682_v59  ;;  %v1857_v2 = vadd.f32 %v1852_v62, %v1769_v60  ;;  %v3696_v59 = vld [vmem:[%s4332_s5 + $0x28] sm:$0xff]  ;;  %v3698_v60 = vld [vmem:[%s4332_s5 + $0x30] sm:$0xff] }
 0x2ca   : > { %v1854_v1 = vpop.f32.mrf.mxu0 }
 0x2cb   : > { %v1858_v4 = vadd.f32 %v1854_v1, %v1770_v63 }
 0x2cd   : > { %v1940_v3 = vpop.f32.mrf.mxu1 }
 0x2ce   : > { %v1945_v5 = vadd.f32 %v1940_v3, %v1857_v2 }
 0x2cf   : > { %v1942_v10 = vpop.f32.mrf.mxu1 }
 0x2d0   : > { %v1953_v11 = vadd.f32 %v1951_v8, %v1945_v5  ;;  %v1946_v12 = vadd.f32 %v1942_v10, %v1858_v4  ;;  %v3700_v4 = vld [vmem:[%s4332_s5 + $0x38] sm:$0xff] }
 0x2d2   : > { %v1955_v14 = vmax.f32 %v1953_v11, 0.0  ;;  %v1954_v22 = vadd.f32 %v1951_v8, %v1946_v12 }
 0x2d4   : > { %v1967_v25 = vsel %vm1961_vm4, %v1955_v14, 0.0  ;;  %v1956_v15 = vmax.f32 %v1954_v22, 0.0 }
 0x2d5   : > { %2143 = vrot.lane.b32.xlu0 %v1967_v25, %s3779_s16  ;;  %1982 = vrot.lane.b32.xlu1 %v1967_v25, %s3777_s15 }
 0x2d6   : > { %3726 = vmatprep.subr.msk.mxu1 %vm1962_vm5, %v1956_v15  ;;  %v1968_v26 = vsel %vm1962_vm5, %v1956_v15, 0.0 }
 0x2d7   : > { %3727 = vmatpush1.msk.msra.mxu1 %vm1961_vm4, %v1955_v14 }
 0x2d8   : > { %3689 = vmatmul.mubr.msk.f32.vlgmr.msra.gmra.mxu1 %vm366_vm0, %v1973_v19 }
 0x2d9   : > { %2321 = vrot.lane.b32.xlu0 %v1967_v25, %s3781_s19  ;;  %2232 = vrot.lane.b32.xlu1 %v1967_v25, %s3778_s11 }
 0x2da   : > { %2308 = vmatprep.mubr.f32.mxu1 %v3767_v0 }
 0x2dd   : > { %2499 = vrot.lane.b32.xlu0 %v1967_v25, %s3783_s21  ;;  %2410 = vrot.lane.b32.xlu1 %v1967_v25, %s3780_s18 }
 0x2e1   : > { %1984 = vrot.lane.b32.xlu0 %v1968_v26, %s3777_s15  ;;  %2588 = vrot.lane.b32.xlu1 %v1967_v25, %s3782_s20 }
 0x2e5   : > { %2677 = vrot.lane.b32.xlu0 %v1967_v25, %s3784_s24  ;;  %2145 = vrot.lane.b32.xlu1 %v1968_v26, %s3779_s16 }
 0x2e9   : > { %2234 = vrot.lane.b32.xlu0 %v1968_v26, %s3778_s11  ;;  %2323 = vrot.lane.b32.xlu1 %v1968_v26, %s3781_s19 }
 0x2ed   : > { %2412 = vrot.lane.b32.xlu0 %v1968_v26, %s3780_s18  ;;  %2501 = vrot.lane.b32.xlu1 %v1968_v26, %s3783_s21 }
 0x2f1   : > { %2590 = vrot.lane.b32.xlu0 %v1968_v26, %s3782_s20  ;;  %2679 = vrot.lane.b32.xlu1 %v1968_v26, %s3784_s24 }
 0x2f5   : > { %2675 = vrot.lane.b32.xlu0 %v3767_v0, %s3784_s24  ;;  %2765 = vperm.xlu1 %3758, %v2762_v16  }
 0x2f9   : > { %2785 = vrot.lane.b32.xlu0 %v3767_v0, %s3777_s15  ;;  %2945 = vrot.lane.b32.xlu1 %v3767_v0, %s3779_s16 }
 0x2fd   : > { %3033 = vrot.lane.b32.xlu0 %v3767_v0, %s3778_s11  ;;  %3121 = vrot.lane.b32.xlu1 %v3767_v0, %s3781_s19 }
 0x301   : > { %3209 = vrot.lane.b32.xlu0 %v3767_v0, %s3780_s18  ;;  %3297 = vrot.lane.b32.xlu1 %v3767_v0, %s3783_s21 }
 0x305   : > { %3385 = vrot.lane.b32.xlu0 %v3767_v0, %s3782_s20 }
 0x347   : > { %v1983_v29 = vpop.permute.xlu1 %1982  ;;  %v2144_v30 = vpop.permute.xlu0 %2143 }
 0x348   : > { %v1987_v41 = vsel %vm1986_vm6, %v1981_v17, %v1983_v29  ;;  %v2148_v46 = vsel %vm2147_vm7, %v2142_v20, %v2144_v30 }
 0x34b   : > { %v2233_v31 = vpop.permute.xlu1 %2232  ;;  %v2322_v32 = vpop.permute.xlu0 %2321 }
 0x34c   : > { %v2237_v53 = vsel %vm2236_vm8, %v2231_v18, %v2233_v31  ;;  %v2326_v54 = vsel %vm2325_vm9, %v2320_v24, %v2322_v32 }
 0x34f   : > { %v2411_v33 = vpop.permute.xlu1 %2410  ;;  %v2500_v35 = vpop.permute.xlu0 %2499 }
 0x350   : > { %v2415_v61 = vsel %vm2414_vm10, %v2409_v23, %v2411_v33  ;;  %v2504_v62 = vsel %vm2503_vm11, %v2498_v28, %v2500_v35 }
 0x353   : > { %v4166_v36 = vpop.permute.xlu1 %2588  ;;  %v1985_v38 = vpop.permute.xlu0 %1984 }
 0x354   : > { %v1988_v39 = vsel %vm1986_vm6, %v1983_v29, %v1985_v38  ;;  %v2593_v5 = vsel %vm2592_vm15, %v4164_v27, %v4166_v36 }
 0x355   : > { %2024 = vmatprep.subr.mxu0 %v1988_v39 }
 0x356   : > { %2025 = vmatpush1.msra.mxu0 %v1987_v41 }
 0x357   : > { %v2146_v42 = vpop.permute.xlu1 %2145  ;;  %3688 = vmatmul.mubr.msk.f32.vlgmr.msra.gmra.mxu0 %vm366_vm0, %v3687_v40  ;;  %v2678_v43 = vpop.permute.xlu0 %2677 }
 0x358   : > { %v2149_v44 = vsel %vm2147_vm7, %v2144_v30, %v2146_v42  ;;  %2219 = vmatprep.mubr.f32.mxu0 %v3767_v0 }
 0x359   : > { %2185 = vmatprep.subr.mxu0 %v2149_v44 }
 0x35a   : > { %2186 = vmatpush1.msra.mxu0 %v2148_v46 }
 0x35b   : > { %v2324_v47 = vpop.permute.xlu1 %2323  ;;  %3691 = vmatmul.mubr.msk.f32.vlgmr.msra.gmra.mxu0 %vm366_vm0, %v3690_v45  ;;  %v2235_v48 = vpop.permute.xlu0 %2234 }
 0x35c   : > { %v2238_v49 = vsel %vm2236_vm8, %v2233_v31, %v2235_v48  ;;  %v2327_v50 = vsel %vm2325_vm9, %v2322_v32, %v2324_v47  ;;  %2397 = vmatprep.mubr.f32.mxu0 %v3767_v0 }
 0x35d   : > { %2274 = vmatprep.subr.mxu1 %v2238_v49  ;;  %2363 = vmatprep.subr.mxu0 %v2327_v50 }
 0x35e   : > { %2275 = vmatpush1.msra.mxu1 %v2237_v53  ;;  %2364 = vmatpush1.msra.mxu0 %v2326_v54 }
 0x35f   : > { %v2502_v55 = vpop.permute.xlu1 %2501  ;;  %3693 = vmatmul.mubr.msk.f32.vlgmr.msra.gmra.mxu1 %vm366_vm0, %v3692_v51  ;;  %v2413_v56 = vpop.permute.xlu0 %2412  ;;  %3695 = vmatmul.mubr.msk.f32.vlgmr.msra.gmra.mxu0 %vm366_vm0, %v3694_v52  ;;  %v2778_v52 = vld [vmem:[%s4334_s7] sm:$0xff] }
 0x360   : > { %v2416_v57 = vsel %vm2414_vm10, %v2411_v33, %v2413_v56  ;;  %v2505_v58 = vsel %vm2503_vm11, %v2500_v35, %v2502_v55  ;;  %2486 = vmatprep.mubr.f32.mxu1 %v3767_v0  ;;  %2575 = vmatprep.mubr.f32.mxu0 %v3767_v0 }
 0x361   : > { %2452 = vmatprep.subr.mxu1 %v2416_v57  ;;  %2541 = vmatprep.subr.mxu0 %v2505_v58 }
 0x362   : > { %2453 = vmatpush1.msra.mxu1 %v2415_v61  ;;  %2542 = vmatpush1.msra.mxu0 %v2504_v62 }
 0x363   : > { %v2680_v63 = vpop.permute.xlu1 %2679  ;;  %3697 = vmatmul.mubr.msk.f32.vlgmr.msra.gmra.mxu1 %vm366_vm0, %v3696_v59  ;;  %v2591_v1 = vpop.permute.xlu0 %2590  ;;  %3699 = vmatmul.mubr.msk.f32.vlgmr.msra.gmra.mxu0 %vm366_vm0, %v3698_v60 }
 0x364   : > { %v2594_v2 = vsel %vm2592_vm15, %v4166_v36, %v2591_v1  ;;  %v2683_v3 = vsel %vm2681_vm12, %v2678_v43, %v2680_v63  ;;  %2664 = vmatprep.mubr.f32.mxu1 %v3767_v0  ;;  %2753 = vmatprep.mubr.f32.mxu0 %v3767_v0 }
 0x365   : > { %2630 = vmatprep.subr.mxu1 %v2594_v2  ;;  %2719 = vmatprep.subr.mxu0 %v2683_v3 }
 0x366   : > { %2631 = vmatpush1.msra.mxu1 %v2593_v5 }
 0x367   : > { %3701 = vmatmul.mubr.msk.f32.vlgmr.msra.gmra.mxu1 %vm366_vm0, %v3700_v4  ;;  %v2676_v6 = vpop.permute.xlu0 %2675 }
 0x368   : > { %v2682_v8 = vsel %vm2681_vm12, %v2676_v6, %v2678_v43  ;;  %2862 = vmatprep.mubr.f32.mxu1 %v3767_v0  ;;  %v3704_v6 = vld [vmem:[%s4334_s7 + $0x8] sm:$0xff] }
 0x369   : > { %2720 = vmatpush1.msra.mxu0 %v2682_v8 }
 0x36a   : > { %3703 = vmatmul.mubr.msk.f32.vlgmr.msra.gmra.mxu0 %vm366_vm0, %v3702_v7 }
 0x36b   : > { %2936 = vmatprep.mubr.f32.mxu0 %v3767_v0  ;;  %v2786_v53 = vpop.permute.xlu0 %2785 }
 0x36f   : > { %v3034_v55 = vpop.permute.xlu0 %3033 }
 0x370   : > { %v2766_v43 = vpop.permute.xlu1 %2765 }
 0x373   : > { %v3210_v57 = vpop.permute.xlu0 %3209 }
 0x374   : > { %v2946_v54 = vpop.permute.xlu1 %2945 }
 0x377   : > { %v4261_v59 = vpop.permute.xlu0 %3385 }
 0x378   : > { %v3122_v56 = vpop.permute.xlu1 %3121 }
 0x37c   : > { %v3298_v58 = vpop.permute.xlu1 %3297 }
 0x398   : > { %v2134_v10 = vpop.f32.mrf.mxu1 }
 0x39a   : > { %v2136_v21 = vpop.f32.mrf.mxu1 }
 0x417   : > { %v2060_v11 = vpop.f32.mrf.mxu0 }
 0x418   : > { %v2135_v12 = vadd.f32 %v2134_v10, %v2060_v11 }
 0x419   : > { %v2062_v13 = vpop.f32.mrf.mxu0 }
 0x41a   : > { %v2137_v22 = vadd.f32 %v2136_v21, %v2062_v13 }
 0x41b   : > { %v2221_v14 = vpop.f32.mrf.mxu0 }
 0x41c   : > { %v2226_v25 = vadd.f32 %v2221_v14, %v2135_v12  ;;  %v3707_v12 = vld [vmem:[%s4334_s7 + $0x10] sm:$0xff] }
 0x41d   : > { %v2223_v15 = vpop.f32.mrf.mxu0 }
 0x41e   : > { %v2227_v16 = vadd.f32 %v2223_v15, %v2137_v22  ;;  %v3709_v15 = vld [vmem:[%s4334_s7 + $0x18] sm:$0xff] }
 0x41f   : > { %v2310_v19 = vpop.f32.mrf.mxu1  ;;  %v2399_v26 = vpop.f32.mrf.mxu0 }
 0x420   : > { %v2315_v17 = vadd.f32 %v2310_v19, %v2226_v25  ;;  %v3711_v19 = vld [vmem:[%s4334_s7 + $0x20] sm:$0xff] }
 0x421   : > { %v2312_v18 = vpop.f32.mrf.mxu1  ;;  %v2401_v20 = vpop.f32.mrf.mxu0 }
 0x422   : > { %v2404_v23 = vadd.f32 %v2399_v26, %v2315_v17  ;;  %v2316_v24 = vadd.f32 %v2312_v18, %v2227_v16 }
 0x423   : > { %v2488_v27 = vpop.f32.mrf.mxu1  ;;  %v2577_v28 = vpop.f32.mrf.mxu0 }
 0x424   : > { %v2405_v29 = vadd.f32 %v2401_v20, %v2316_v24  ;;  %v2493_v30 = vadd.f32 %v2488_v27, %v2404_v23  ;;  %v3713_v24 = vld [vmem:[%s4334_s7 + $0x28] sm:$0xff]  ;;  %v3715_v27 = vld [vmem:[%s4334_s7 + $0x30] sm:$0xff] }
 0x425   : > { %v2490_v31 = vpop.f32.mrf.mxu1  ;;  %v2579_v32 = vpop.f32.mrf.mxu0 }
 0x426   : > { %v2582_v33 = vadd.f32 %v2577_v28, %v2493_v30  ;;  %v2494_v35 = vadd.f32 %v2490_v31, %v2405_v29 }
 0x427   : > { %v2666_v36 = vpop.f32.mrf.mxu1 }
 0x428   : > { %v2583_v38 = vadd.f32 %v2579_v32, %v2494_v35  ;;  %v2671_v39 = vadd.f32 %v2666_v36, %v2582_v33  ;;  %v3717_v35 = vld [vmem:[%s4334_s7 + $0x38] sm:$0xff] }
 0x429   : > { %v2668_v40 = vpop.f32.mrf.mxu1 }
 0x42a   : > { %v2672_v41 = vadd.f32 %v2668_v40, %v2583_v38  ;;  %v2755_v42 = vpop.f32.mrf.mxu0 }
 0x42b   : > { %v2760_v44 = vadd.f32 %v2755_v42, %v2671_v39  ;;  %v3719_v39 = vld [vmem:[%s4334_s7 + $0x40] sm:$0xff] }
 0x42c   : > { %v2757_v45 = vpop.f32.mrf.mxu0 }
 0x42d   : > { %v2768_v46 = vadd.f32 %v2766_v43, %v2760_v44  ;;  %v2761_v47 = vadd.f32 %v2757_v45, %v2672_v41 }
 0x42f   : > { %v2770_v48 = vmax.f32 %v2768_v46, 0.0  ;;  %v2769_v49 = vadd.f32 %v2766_v43, %v2761_v47 }
 0x431   : > { %v2772_v50 = vsel %vm3980_vm13, %v2770_v48, 0.0  ;;  %v2771_v51 = vmax.f32 %v2769_v49, 0.0 }
 0x432   : > { %2947 = vrot.lane.b32.xlu1 %v2772_v50, %s3779_s16  ;;  %2787 = vrot.lane.b32.xlu0 %v2772_v50, %s3777_s15 }
 0x433   : > { %3728 = vmatprep.subr.msk.mxu0 %vm3984_vm14, %v2771_v51  ;;  %v2773_v34 = vsel %vm3984_vm14, %v2771_v51, 0.0 }
 0x434   : > { %3729 = vmatpush1.msk.msra.mxu0 %vm3980_vm13, %v2770_v48 }
 0x435   : > { %3706 = vmatmul.mubr.msk.f32.vlgmr.msra.gmra.mxu0 %vm366_vm0, %v2778_v52 }
 0x436   : > { %3123 = vrot.lane.b32.xlu1 %v2772_v50, %s3781_s19  ;;  %3035 = vrot.lane.b32.xlu0 %v2772_v50, %s3778_s11 }
 0x437   : > { %3110 = vmatprep.mubr.f32.mxu0 %v3767_v0 }
 0x43a   : > { %3299 = vrot.lane.b32.xlu1 %v2772_v50, %s3783_s21  ;;  %3211 = vrot.lane.b32.xlu0 %v2772_v50, %s3780_s18 }
 0x43e   : > { %3387 = vrot.lane.b32.xlu0 %v2772_v50, %s3782_s20  ;;  %2789 = vrot.lane.b32.xlu1 %v2773_v34, %s3777_s15  ;;  %s330_s15 = scalar_lea.vmem %s4336_s9, %s3652_s14 }
 0x442   : > { %2949 = vrot.lane.b32.xlu0 %v2773_v34, %s3779_s16  ;;  %3475 = vrot.lane.b32.xlu1 %v2772_v50, %s3784_s24 }
 0x446   : > { %3125 = vrot.lane.b32.xlu0 %v2773_v34, %s3781_s19  ;;  %3037 = vrot.lane.b32.xlu1 %v2773_v34, %s3778_s11 }
 0x44a   : > { %3301 = vrot.lane.b32.xlu0 %v2773_v34, %s3783_s21  ;;  %3213 = vrot.lane.b32.xlu1 %v2773_v34, %s3780_s18 }
 0x44e   : > { %3477 = vrot.lane.b32.xlu0 %v2773_v34, %s3784_s24  ;;  %3389 = vrot.lane.b32.xlu1 %v2773_v34, %s3782_s20 }
 0x452   : > { %3562 = vperm.xlu0 %3757, %v3559_v37   ;;  %3473 = vrot.lane.b32.xlu1 %v3767_v0, %s3784_s24 }
 0x4a4   : > { %v2948_v60 = vpop.permute.xlu1 %2947  ;;  %v2788_v61 = vpop.permute.xlu0 %2787 }
 0x4a5   : > { %v2791_v7 = vsel %vm1986_vm6, %v2786_v53, %v2788_v61  ;;  %v2951_v13 = vsel %vm2147_vm7, %v2946_v54, %v2948_v60 }
 0x4a8   : > { %v3124_v62 = vpop.permute.xlu1 %3123  ;;  %v3036_v63 = vpop.permute.xlu0 %3035 }
 0x4a9   : > { %v3127_v26 = vsel %vm2325_vm9, %v3122_v56, %v3124_v62  ;;  %v3039_v16 = vsel %vm2236_vm8, %v3034_v55, %v3036_v63 }
 0x4ac   : > { %v3300_v1 = vpop.permute.xlu1 %3299  ;;  %v3212_v2 = vpop.permute.xlu0 %3211 }
 0x4ad   : > { %v3303_v28 = vsel %vm2503_vm11, %v3298_v58, %v3300_v1  ;;  %v3215_v29 = vsel %vm2414_vm10, %v3210_v57, %v3212_v2 }
 0x4b0   : > { %v2790_v3 = vpop.permute.xlu1 %2789  ;;  %v3388_v4 = vpop.permute.xlu0 %3387 }
 0x4b1   : > { %v2792_v5 = vsel %vm1986_vm6, %v2788_v61, %v2790_v3  ;;  %v3391_v36 = vsel %vm2592_vm15, %v4261_v59, %v3388_v4 }
 0x4b2   : > { %2828 = vmatprep.subr.mxu1 %v2792_v5 }
 0x4b3   : > { %2829 = vmatpush1.msra.mxu1 %v2791_v7 }
 0x4b4   : > { %v3476_v8 = vpop.permute.xlu1 %3475  ;;  %v2950_v10 = vpop.permute.xlu0 %2949  ;;  %3705 = vmatmul.mubr.msk.f32.vlgmr.msra.gmra.mxu1 %vm366_vm0, %v3704_v6 }
 0x4b5   : > { %v2952_v11 = vsel %vm2147_vm7, %v2948_v60, %v2950_v10  ;;  %3022 = vmatprep.mubr.f32.mxu1 %v3767_v0 }
 0x4b6   : > { %2988 = vmatprep.subr.mxu1 %v2952_v11 }
 0x4b7   : > { %2989 = vmatpush1.msra.mxu1 %v2951_v13 }
 0x4b8   : > { %v3038_v21 = vpop.permute.xlu1 %3037  ;;  %v3126_v14 = vpop.permute.xlu0 %3125  ;;  %3708 = vmatmul.mubr.msk.f32.vlgmr.msra.gmra.mxu1 %vm366_vm0, %v3707_v12 }
 0x4b9   : > { %v3040_v22 = vsel %vm2236_vm8, %v3036_v63, %v3038_v21  ;;  %v3128_v25 = vsel %vm2325_vm9, %v3124_v62, %v3126_v14  ;;  %3198 = vmatprep.mubr.f32.mxu1 %v3767_v0  ;;  %v3576_v14 = vshrl.u32 %v331_v9, 7 }
 0x4ba   : > { %3076 = vmatprep.subr.mxu0 %v3040_v22  ;;  %3164 = vmatprep.subr.mxu1 %v3128_v25 }
 0x4bb   : > { %3077 = vmatpush1.msra.mxu0 %v3039_v16  ;;  %3165 = vmatpush1.msra.mxu1 %v3127_v26 }
 0x4bc   : > { %v3214_v17 = vpop.permute.xlu1 %3213  ;;  %3710 = vmatmul.mubr.msk.f32.vlgmr.msra.gmra.mxu0 %vm366_vm0, %v3709_v15  ;;  %v3302_v18 = vpop.permute.xlu0 %3301  ;;  %3712 = vmatmul.mubr.msk.f32.vlgmr.msra.gmra.mxu1 %vm366_vm0, %v3711_v19 }
 0x4bd   : > { %v3216_v20 = vsel %vm2414_vm10, %v3212_v2, %v3214_v17  ;;  %v3304_v23 = vsel %vm2503_vm11, %v3300_v1, %v3302_v18  ;;  %3286 = vmatprep.mubr.f32.mxu0 %v3767_v0  ;;  %3374 = vmatprep.mubr.f32.mxu1 %v3767_v0 }
 0x4be   : > { %3252 = vmatprep.subr.mxu0 %v3216_v20  ;;  %3340 = vmatprep.subr.mxu1 %v3304_v23 }
 0x4bf   : > { %3253 = vmatpush1.msra.mxu0 %v3215_v29  ;;  %3341 = vmatpush1.msra.mxu1 %v3303_v28 }
 0x4c0   : > { %v3390_v30 = vpop.permute.xlu1 %3389  ;;  %3714 = vmatmul.mubr.msk.f32.vlgmr.msra.gmra.mxu0 %vm366_vm0, %v3713_v24  ;;  %v3478_v31 = vpop.permute.xlu0 %3477  ;;  %3716 = vmatmul.mubr.msk.f32.vlgmr.msra.gmra.mxu1 %vm366_vm0, %v3715_v27 }
 0x4c1   : > { %v3392_v32 = vsel %vm2592_vm15, %v3388_v4, %v3390_v30  ;;  %v3480_v33 = vsel %vm2681_vm12, %v3476_v8, %v3478_v31  ;;  %3462 = vmatprep.mubr.f32.mxu0 %v3767_v0  ;;  %3550 = vmatprep.mubr.f32.mxu1 %v3767_v0  ;;  %v3785_v4 = vmov 1966171168  }
 0x4c2   : > { %3428 = vmatprep.subr.mxu0 %v3392_v32  ;;  %3516 = vmatprep.subr.mxu1 %v3480_v33  ;;  %v3573_v5 = vunpack.c.l.s4 %v3785_v4 }
 0x4c3   : > { %3429 = vmatpush1.msra.mxu0 %v3391_v36 }
 0x4c4   : > { %v3474_v38 = vpop.permute.xlu1 %3473  ;;  %3718 = vmatmul.mubr.msk.f32.vlgmr.msra.gmra.mxu0 %vm366_vm0, %v3717_v35  ;;  %v3574_v21 = vunpack.c.0.s8 %v3573_v5 }
 0x4c5   : > { %v3479_v40 = vsel %vm2681_vm12, %v3474_v38, %v3476_v8 }
 0x4c6   : > { %3517 = vmatpush1.msra.mxu1 %v3479_v40  ;;  %v3577_v19 = vsub.s32 %v3574_v21, %v3576_v14 }
 0x4c7   : > { %3720 = vmatmul.mubr.msk.f32.vlgmr.msra.gmra.mxu1 %vm366_vm0, %v3719_v39  ;;  %vm3589_vm0 = vcmp.lt.s32.totalorder %v331_v9, 256 }
 0x4cd   : > { %v3563_v10 = vpop.permute.xlu0 %3562 }
 0x4f5   : > { %v2938_v41 = vpop.f32.mrf.mxu0 }
 0x4f7   : > { %v2940_v44 = vpop.f32.mrf.mxu0 }
 0x574   : > { %v2864_v0 = vpop.f32.mrf.mxu1 }
 0x575   : > { %v2939_v42 = vadd.f32 %v2938_v41, %v2864_v0 }
 0x576   : > { %v2866_v43 = vpop.f32.mrf.mxu1 }
 0x577   : > { %v2941_v46 = vadd.f32 %v2940_v44, %v2866_v43 }
 0x578   : > { %v3024_v45 = vpop.f32.mrf.mxu1 }
 0x579   : > { %v3029_v47 = vadd.f32 %v3024_v45, %v2939_v42 }
 0x57a   : > { %v3026_v48 = vpop.f32.mrf.mxu1 }
 0x57b   : > { %v3030_v51 = vadd.f32 %v3026_v48, %v2941_v46 }
 0x57c   : > { %v3112_v49 = vpop.f32.mrf.mxu0  ;;  %v3200_v50 = vpop.f32.mrf.mxu1 }
 0x57d   : > { %v3117_v52 = vadd.f32 %v3112_v49, %v3029_v47 }
 0x57e   : > { %v3114_v34 = vpop.f32.mrf.mxu0  ;;  %v3202_v37 = vpop.f32.mrf.mxu1 }
 0x57f   : > { %v3118_v53 = vadd.f32 %v3114_v34, %v3030_v51  ;;  %v3205_v54 = vadd.f32 %v3200_v50, %v3117_v52 }
 0x580   : > { %v3288_v55 = vpop.f32.mrf.mxu0  ;;  %v3376_v56 = vpop.f32.mrf.mxu1 }
 0x581   : > { %v3206_v57 = vadd.f32 %v3202_v37, %v3118_v53  ;;  %v3293_v58 = vadd.f32 %v3288_v55, %v3205_v54 }
 0x582   : > { %v3290_v59 = vpop.f32.mrf.mxu0  ;;  %v3378_v60 = vpop.f32.mrf.mxu1 }
 0x583   : > { %v3294_v61 = vadd.f32 %v3290_v59, %v3206_v57  ;;  %v3381_v62 = vadd.f32 %v3376_v56, %v3293_v58 }
 0x584   : > { %v3464_v63 = vpop.f32.mrf.mxu0 }
 0x585   : > { %v3382_v1 = vadd.f32 %v3378_v60, %v3294_v61  ;;  %v3469_v2 = vadd.f32 %v3464_v63, %v3381_v62 }
 0x586   : > { %v3466_v3 = vpop.f32.mrf.mxu0 }
 0x587   : > { %v3470_v6 = vadd.f32 %v3466_v3, %v3382_v1  ;;  %v3552_v7 = vpop.f32.mrf.mxu1 }
 0x588   : > { %v3557_v8 = vadd.f32 %v3552_v7, %v3469_v2 }
 0x589   : > { %v3554_v11 = vpop.f32.mrf.mxu1 }
 0x58a   : > { %v3565_v12 = vadd.f32 %v3563_v10, %v3557_v8  ;;  %v3558_v13 = vadd.f32 %v3554_v11, %v3470_v6 }
 0x58c   : > { %v3566_v22 = vadd.f32 %v3563_v10, %v3558_v13  ;;  %v3567_v25 = vmax.f32 %v3565_v12, 0.0 }
 0x58e   : > { %v3568_v15 = vmax.f32 %v3566_v22, 0.0 }
 0x590   : > { %v3571_v26 = vcombine.low %v3567_v25, %v3568_v15 }
 0x592   : > { %v3578_v16 = vrot.slane %v3571_v26, %v3577_v19 }
 0x594   : > { %v3585_v17 = vrot.slane %v3578_v16, %v3577_v19 }
 0x596   : > { %3591 = vst.msk [vmem:[%s330_s15] sm:$0x3] %vm3589_vm0, %v3585_v17 }
 0x597 PF: > { %s19_s30 = sadd.s32 1, %s3765_s30  }
 0x598   : > { %p16_p4 = scmp.ge.s32.totalorder %s19_s30, 4  }
 0x59a   :  { %18 = sbr.rel (!%p16_p4) target bundleno = 1 (0x1), region = 118 }

</bundles_post_ra>
